<compile_context>
chip_gen: v7x
topology: tpu7x:2x2x1
jax: 0.10.0
libtpu: 0.0.40
codegen_flags: <defaults>
</compile_context>

<pallas_src>
import functools

import jax
import jax.numpy as jnp
from jax.experimental import pallas as pl
from jax.experimental.pallas import tpu as pltpu


def _round_up(n, m):
    return (n + m - 1) // m * m


# ----------------------------- Pallas kernel --------------------------------
def vae_kernel(x_ref, eps_ref,
               w1_ref, b1_ref, w23_ref, b23_ref,
               w4_ref, b4_ref, w5_ref, b5_ref,
               xrec_ref, mulv_ref, *, z_pad):
    f32 = jnp.float32
    x = x_ref[...]

    # fc1 + relu  (MXU, f32 accumulate; bias/relu epilogue in f32)
    h = jnp.dot(x.astype(w1_ref.dtype), w1_ref[...], preferred_element_type=f32)
    h = jnp.maximum(h + b1_ref[...], 0.0)

    # fused fc2 || fc3 (+ zero padding) + relu : one lane-dense MXU pass.
    # Packed layout: lanes [0, z_pad) = mu, lanes [z_pad, 2*z_pad) = logvar.
    s = jnp.dot(h.astype(w23_ref.dtype), w23_ref[...], preferred_element_type=f32)
    s = jnp.maximum(s + b23_ref[...], 0.0)
    mulv_ref[...] = s.astype(mulv_ref.dtype)   # single 128-lane-aligned store

    mu = s[:, :z_pad]                 # 128-aligned -> free vreg select
    logvar = s[:, z_pad:2 * z_pad]    # 128-aligned -> no lane rotates

    # reparameterize: z = mu + eps * exp(logvar / 2)   (exp -> EUP slot)
    z = mu + eps_ref[...].astype(f32) * jnp.exp(logvar * 0.5)

    # fc4 + relu (contraction dim = z_pad = 128-aligned; w4 rows zero-padded)
    h2 = jnp.dot(z.astype(w4_ref.dtype), w4_ref[...], preferred_element_type=f32)
    h2 = jnp.maximum(h2 + b4_ref[...], 0.0)

    # fc5 + sigmoid (stable tanh form; tanh -> EUP)
    logits = jnp.dot(h2.astype(w5_ref.dtype), w5_ref[...], preferred_element_type=f32)
    logits = logits + b5_ref[...]
    if jnp.dtype(xrec_ref.dtype) == jnp.dtype(jnp.bfloat16):
        # bf16 EUP epilogue + bf16 output stream (v6e/v7x option)
        logits = logits.astype(jnp.bfloat16)
    xrec_ref[...] = (0.5 * jnp.tanh(0.5 * logits) + 0.5).astype(xrec_ref.dtype)


# ------------------------------ host wrapper ---------------------------------
@functools.partial(jax.jit, static_argnames=("tm", "matmul_dtype", "xrec_dtype"))
def vae_forward(x, eps, params, *, tm=256,
                matmul_dtype=jnp.bfloat16, xrec_dtype=jnp.float32):
    """Returns (x_reconst[B, D], mu[B, Z], logvar[B, Z])."""
    B, D = x.shape
    H = params["w1"].shape[1]
    Z = params["w2"].shape[1]

    # 128-lane padding of every feature dimension.
    Dp = _round_up(D, 128)
    Hp = _round_up(H, 128)
    Zpad = _round_up(Z, 128)
    Zp = 2 * Zpad                       # packed [mu | logvar], vreg-aligned

    f32 = jnp.float32
    # fc1
    w1 = jnp.zeros((Dp, Hp), f32).at[:D, :H].set(params["w1"])
    b1 = jnp.zeros((1, Hp), f32).at[:, :H].set(params["b1"])
    # fused fc2 || fc3: mu cols at [0:Z], logvar cols at [Zpad:Zpad+Z]
    w23 = (jnp.zeros((Hp, Zp), f32)
           .at[:H, :Z].set(params["w2"])
           .at[:H, Zpad:Zpad + Z].set(params["w3"]))
    b23 = (jnp.zeros((1, Zp), f32)
           .at[:, :Z].set(params["b2"])
           .at[:, Zpad:Zpad + Z].set(params["b3"]))
    # fc4 (zero-padded rows -> K = Zpad on the MXU)
    w4 = jnp.zeros((Zpad, Hp), f32).at[:Z, :H].set(params["w4"])
    b4 = jnp.zeros((1, Hp), f32).at[:, :H].set(params["b4"])
    # fc5
    w5 = jnp.zeros((Hp, Dp), f32).at[:H, :D].set(params["w5"])
    b5 = jnp.zeros((1, Dp), f32).at[:, :D].set(params["b5"])

    # MXU operand dtype (bf16 default); biases stay f32.
    w1 = w1.astype(matmul_dtype)
    w23 = w23.astype(matmul_dtype)
    w4 = w4.astype(matmul_dtype)
    w5 = w5.astype(matmul_dtype)

    # Batch tile: cap at tm, keep >= 4 grid steps when B allows so both v7x
    # TensorCores get >= 2 steps each and DMA pipelines behind compute.
    tm = max(8, min(tm, _round_up(B, 8)))
    while tm > 128 and pl.cdiv(B, tm) < 4:
        tm //= 2
    Bp = _round_up(B, tm)

    # Pad streamed inputs (zeros: padded rows/lanes contribute nothing).
    x_p = jnp.zeros((Bp, Dp), x.dtype).at[:B, :D].set(x)
    eps_p = jnp.zeros((Bp, Zpad), eps.dtype).at[:B, :Z].set(eps)

    grid = (Bp // tm,)

    def batch_spec(width):
        return pl.BlockSpec((tm, width), lambda i: (i, 0))

    def resident(a):  # whole array, same block every step -> VMEM-resident
        return pl.BlockSpec(a.shape, lambda i: (0, 0))

    wbytes = jnp.dtype(matmul_dtype).itemsize
    weight_elems = Dp * Hp + Hp * Zp + Zpad * Hp + Hp * Dp
    cost = pl.CostEstimate(
        flops=int(2 * Bp * weight_elems),
        transcendentals=int(Bp * (Zpad + Dp)),
        bytes_accessed=int(
            x_p.dtype.itemsize * Bp * Dp          # x
            + eps_p.dtype.itemsize * Bp * Zpad    # eps
            + wbytes * weight_elems               # weights
            + 4 * (Hp + Zp + Hp + Dp)             # biases
            + jnp.dtype(xrec_dtype).itemsize * Bp * Dp   # x_reconst
            + 4 * Bp * Zp),                       # packed mu||logvar
    )

    xrec, mulv = pl.pallas_call(
        functools.partial(vae_kernel, z_pad=Zpad),
        grid=grid,
        in_specs=[
            batch_spec(Dp),            # x
            batch_spec(Zpad),          # eps (lane-dense 128-wide block)
            resident(w1), resident(b1),
            resident(w23), resident(b23),
            resident(w4), resident(b4),
            resident(w5), resident(b5),
        ],
        out_specs=(batch_spec(Dp), batch_spec(Zp)),
        out_shape=(jax.ShapeDtypeStruct((Bp, Dp), xrec_dtype),
                   jax.ShapeDtypeStruct((Bp, Zp), jnp.float32)),
        compiler_params=pltpu.CompilerParams(
            dimension_semantics=("parallel",)),
        cost_estimate=cost,
    )(x_p, eps_p, w1, b1, w23, b23, w4, b4, w5, b5)

    return xrec[:B, :D], mulv[:B, :Z], mulv[:B, Zpad:Zpad + Z]


# ------------------------------- init / ref ----------------------------------
def init_params(key, image_size, h_dim, z_dim):
    """nn.Linear-style uniform(-1/sqrt(fan_in), +) init; weights stored [in, out]."""
    def linear(k, fan_in, fan_out):
        kw, kb = jax.random.split(k)
        bound = 1.0 / jnp.sqrt(fan_in)
        w = jax.random.uniform(kw, (fan_in, fan_out), jnp.float32, -bound, bound)
        b = jax.random.uniform(kb, (1, fan_out), jnp.float32, -bound, bound)
        return w, b

    keys = jax.random.split(key, 5)
    w1, b1 = linear(keys[0], image_size, h_dim)
    w2, b2 = linear(keys[1], h_dim, z_dim)
    w3, b3 = linear(keys[2], h_dim, z_dim)
    w4, b4 = linear(keys[3], z_dim, h_dim)
    w5, b5 = linear(keys[4], h_dim, image_size)
    return dict(w1=w1, b1=b1, w2=w2, b2=b2, w3=w3, b3=b3,
                w4=w4, b4=b4, w5=w5, b5=b5)


def reference_forward(x, eps, p, matmul_dtype=jnp.float32):
    """Pure-JAX reference of the PyTorch forward (same eps injected)."""
    def lin(a, w, b):
        return jnp.dot(a.astype(matmul_dtype), w.astype(matmul_dtype),
                       preferred_element_type=jnp.float32) + b
    h = jax.nn.relu(lin(x, p["w1"], p["b1"]))
    mu = jax.nn.relu(lin(h, p["w2"], p["b2"]))        # ReLU on mu/logvar is
    logvar = jax.nn.relu(lin(h, p["w3"], p["b3"]))    # what the PyTorch module does
    z = mu + eps * jnp.exp(logvar * 0.5)
    h2 = jax.nn.relu(lin(z, p["w4"], p["b4"]))
    xrec = jax.nn.sigmoid(lin(h2, p["w5"], p["b5"]))
    return xrec, mu, logvar


if __name__ == "__main__":
    # Small shapes consistent with the module's MLP forward (scaled down from
    # image_size=3136, h_dim=400, z_dim=20). None of D/H/Z is a 128-multiple
    # and B is not a tile multiple, so all padding paths are exercised; tm
    # auto-drops to 128 so the grid has 4 steps.
    BATCH, IMAGE_SIZE, H_DIM, Z_DIM = 500, 196, 200, 20

    key = jax.random.PRNGKey(0)
    k_params, k_x, k_eps = jax.random.split(key, 3)

    params = init_params(k_params, IMAGE_SIZE, H_DIM, Z_DIM)
    x = jax.random.uniform(k_x, (BATCH, IMAGE_SIZE), jnp.float32)
    # eps ~ N(0, 1): torch.randn_like replaced by host-side JAX RNG so the
    # kernel is deterministic given (x, eps, params).
    eps = jax.random.normal(k_eps, (BATCH, Z_DIM), jnp.float32)

    # --- default path: bf16 MXU operands, f32 accumulate / epilogue ---
    xr, mu, lv = vae_forward(x, eps, params)
    jax.block_until_ready((xr, mu, lv))
    xr_r, mu_r, lv_r = reference_forward(x, eps, params, matmul_dtype=jnp.bfloat16)
    assert xr.shape == (BATCH, IMAGE_SIZE) and mu.shape == (BATCH, Z_DIM)
    assert jnp.allclose(xr, xr_r, atol=2e-2, rtol=2e-2)
    assert jnp.allclose(mu, mu_r, atol=2e-2, rtol=2e-2)
    assert jnp.allclose(lv, lv_r, atol=2e-2, rtol=2e-2)

    # --- f32 debug path (strict correctness check) ---
    xr32, mu32, lv32 = vae_forward(x, eps, params, matmul_dtype=jnp.float32)
    jax.block_until_ready((xr32, mu32, lv32))
    xr32_r, mu32_r, lv32_r = reference_forward(x, eps, params, matmul_dtype=jnp.float32)
    assert jnp.allclose(xr32, xr32_r, atol=1e-4, rtol=1e-4)
    assert jnp.allclose(mu32, mu32_r, atol=1e-4, rtol=1e-4)
    assert jnp.allclose(lv32, lv32_r, atol=1e-4, rtol=1e-4)

    # --- bf16 epilogue + bf16 x_reconst output (v6e/v7x option), loose check ---
    xr16, mu16, lv16 = vae_forward(x, eps, params, xrec_dtype=jnp.bfloat16)
    jax.block_until_ready((xr16, mu16, lv16))
    assert xr16.dtype == jnp.bfloat16
    assert jnp.allclose(xr16.astype(jnp.float32), xr_r, atol=2e-2, rtol=2e-2)

    print("KERNEL_OK")
</pallas_src>

<mosaic_0001>
module attributes {stable_mosaic.version = 11 : i64} {
  func.func @vae_kernel(%arg0: i32, %arg1: memref<128x256xf32, #tpu.memory_space<vmem>>, %arg2: memref<128x128xf32, #tpu.memory_space<vmem>>, %arg3: memref<256x256xbf16, #tpu.memory_space<vmem>>, %arg4: memref<1x256xf32, #tpu.memory_space<vmem>>, %arg5: memref<256x256xbf16, #tpu.memory_space<vmem>>, %arg6: memref<1x256xf32, #tpu.memory_space<vmem>>, %arg7: memref<128x256xbf16, #tpu.memory_space<vmem>>, %arg8: memref<1x256xf32, #tpu.memory_space<vmem>>, %arg9: memref<256x256xbf16, #tpu.memory_space<vmem>>, %arg10: memref<1x256xf32, #tpu.memory_space<vmem>>, %arg11: memref<128x256xf32, #tpu.memory_space<vmem>>, %arg12: memref<128x256xf32, #tpu.memory_space<vmem>>) attributes {dimension_semantics = [#tpu.dimension_semantics<parallel>], iteration_bounds = array<i64: 4>, scalar_prefetch = 0 : i64, scratch_operands = 0 : i64, tpu.core_type = #tpu.core_type<tc>, window_params = [{transform_indices = @transform_0, window_bounds = array<i64: 128, 256>}, {transform_indices = @transform_1, window_bounds = array<i64: 128, 128>}, {pipeline_mode = #tpu.pipeline_mode<synchronous>, transform_indices = @transform_2, window_bounds = array<i64: 256, 256>}, {pipeline_mode = #tpu.pipeline_mode<synchronous>, transform_indices = @transform_3, window_bounds = array<i64: 1, 256>}, {pipeline_mode = #tpu.pipeline_mode<synchronous>, transform_indices = @transform_4, window_bounds = array<i64: 256, 256>}, {pipeline_mode = #tpu.pipeline_mode<synchronous>, transform_indices = @transform_5, window_bounds = array<i64: 1, 256>}, {pipeline_mode = #tpu.pipeline_mode<synchronous>, transform_indices = @transform_6, window_bounds = array<i64: 128, 256>}, {pipeline_mode = #tpu.pipeline_mode<synchronous>, transform_indices = @transform_7, window_bounds = array<i64: 1, 256>}, {pipeline_mode = #tpu.pipeline_mode<synchronous>, transform_indices = @transform_8, window_bounds = array<i64: 256, 256>}, {pipeline_mode = #tpu.pipeline_mode<synchronous>, transform_indices = @transform_9, window_bounds = array<i64: 1, 256>}, {transform_indices = @transform_10, window_bounds = array<i64: 128, 256>}, {transform_indices = @transform_11, window_bounds = array<i64: 128, 256>}]} {
    %c0 = arith.constant 0 : index
    %c0_0 = arith.constant 0 : index
    %0 = vector.load %arg1[%c0, %c0_0] : memref<128x256xf32, #tpu.memory_space<vmem>>, vector<128x256xf32>
    %1 = arith.truncf %0 : vector<128x256xf32> to vector<128x256xbf16>
    %c0_1 = arith.constant 0 : index
    %c0_2 = arith.constant 0 : index
    %2 = vector.load %arg3[%c0_1, %c0_2] : memref<256x256xbf16, #tpu.memory_space<vmem>>, vector<256x256xbf16>
    %cst = arith.constant dense<0.000000e+00> : vector<128x256xf32>
    %3 = tpu.matmul %1, %2, %cst {dimension_numbers = #tpu.dot_dimension_numbers<[1], [0], [0], [1], [0, 0, 1, 1], [], []>} : vector<128x256xbf16>, vector<256x256xbf16>, vector<128x256xf32> -> vector<128x256xf32>
    %c0_3 = arith.constant 0 : index
    %c0_4 = arith.constant 0 : index
    %4 = vector.load %arg4[%c0_3, %c0_4] : memref<1x256xf32, #tpu.memory_space<vmem>>, vector<1x256xf32>
    %5 = vector.broadcast %4 : vector<1x256xf32> to vector<128x256xf32>
    %6 = arith.addf %3, %5 : vector<128x256xf32>
    %cst_5 = arith.constant 0.000000e+00 : f32
    %7 = vector.broadcast %cst_5 : f32 to vector<128x256xf32>
    %8 = arith.maximumf %6, %7 : vector<128x256xf32>
    %9 = arith.truncf %8 : vector<128x256xf32> to vector<128x256xbf16>
    %c0_6 = arith.constant 0 : index
    %c0_7 = arith.constant 0 : index
    %10 = vector.load %arg5[%c0_6, %c0_7] : memref<256x256xbf16, #tpu.memory_space<vmem>>, vector<256x256xbf16>
    %cst_8 = arith.constant dense<0.000000e+00> : vector<128x256xf32>
    %11 = tpu.matmul %9, %10, %cst_8 {dimension_numbers = #tpu.dot_dimension_numbers<[1], [0], [0], [1], [0, 0, 1, 1], [], []>} : vector<128x256xbf16>, vector<256x256xbf16>, vector<128x256xf32> -> vector<128x256xf32>
    %c0_9 = arith.constant 0 : index
    %c0_10 = arith.constant 0 : index
    %12 = vector.load %arg6[%c0_9, %c0_10] : memref<1x256xf32, #tpu.memory_space<vmem>>, vector<1x256xf32>
    %13 = vector.broadcast %12 : vector<1x256xf32> to vector<128x256xf32>
    %14 = arith.addf %11, %13 : vector<128x256xf32>
    %cst_11 = arith.constant 0.000000e+00 : f32
    %15 = vector.broadcast %cst_11 : f32 to vector<128x256xf32>
    %16 = arith.maximumf %14, %15 : vector<128x256xf32>
    %c0_12 = arith.constant 0 : index
    %c0_13 = arith.constant 0 : index
    %17 = vector.load %arg12[%c0_12, %c0_13] : memref<128x256xf32, #tpu.memory_space<vmem>>, vector<128x256xf32>
    tpu.vector_store %arg12[%c0_12, %c0_13], %16 {strides = array<i32>} : memref<128x256xf32, #tpu.memory_space<vmem>>, vector<128x256xf32>,
    %18 = vector.extract_strided_slice %16 {offsets = [0, 0], sizes = [128, 128], strides = [1, 1]} : vector<128x256xf32> to vector<128x128xf32>
    %19 = vector.extract_strided_slice %16 {offsets = [0, 128], sizes = [128, 128], strides = [1, 1]} : vector<128x256xf32> to vector<128x128xf32>
    %c0_14 = arith.constant 0 : index
    %c0_15 = arith.constant 0 : index
    %20 = vector.load %arg2[%c0_14, %c0_15] : memref<128x128xf32, #tpu.memory_space<vmem>>, vector<128x128xf32>
    %cst_16 = arith.constant 5.000000e-01 : f32
    %21 = vector.broadcast %cst_16 : f32 to vector<128x128xf32>
    %22 = arith.mulf %19, %21 : vector<128x128xf32>
    %23 = math.exp %22 : vector<128x128xf32>
    %24 = arith.mulf %20, %23 : vector<128x128xf32>
    %25 = arith.addf %18, %24 : vector<128x128xf32>
    %26 = arith.truncf %25 : vector<128x128xf32> to vector<128x128xbf16>
    %c0_17 = arith.constant 0 : index
    %c0_18 = arith.constant 0 : index
    %27 = vector.load %arg7[%c0_17, %c0_18] : memref<128x256xbf16, #tpu.memory_space<vmem>>, vector<128x256xbf16>
    %cst_19 = arith.constant dense<0.000000e+00> : vector<128x256xf32>
    %28 = tpu.matmul %26, %27, %cst_19 {dimension_numbers = #tpu.dot_dimension_numbers<[1], [0], [0], [1], [0, 0, 1, 1], [], []>} : vector<128x128xbf16>, vector<128x256xbf16>, vector<128x256xf32> -> vector<128x256xf32>
    %c0_20 = arith.constant 0 : index
    %c0_21 = arith.constant 0 : index
    %29 = vector.load %arg8[%c0_20, %c0_21] : memref<1x256xf32, #tpu.memory_space<vmem>>, vector<1x256xf32>
    %30 = vector.broadcast %29 : vector<1x256xf32> to vector<128x256xf32>
    %31 = arith.addf %28, %30 : vector<128x256xf32>
    %cst_22 = arith.constant 0.000000e+00 : f32
    %32 = vector.broadcast %cst_22 : f32 to vector<128x256xf32>
    %33 = arith.maximumf %31, %32 : vector<128x256xf32>
    %34 = arith.truncf %33 : vector<128x256xf32> to vector<128x256xbf16>
    %c0_23 = arith.constant 0 : index
    %c0_24 = arith.constant 0 : index
    %35 = vector.load %arg9[%c0_23, %c0_24] : memref<256x256xbf16, #tpu.memory_space<vmem>>, vector<256x256xbf16>
    %cst_25 = arith.constant dense<0.000000e+00> : vector<128x256xf32>
    %36 = tpu.matmul %34, %35, %cst_25 {dimension_numbers = #tpu.dot_dimension_numbers<[1], [0], [0], [1], [0, 0, 1, 1], [], []>} : vector<128x256xbf16>, vector<256x256xbf16>, vector<128x256xf32> -> vector<128x256xf32>
    %c0_26 = arith.constant 0 : index
    %c0_27 = arith.constant 0 : index
    %37 = vector.load %arg10[%c0_26, %c0_27] : memref<1x256xf32, #tpu.memory_space<vmem>>, vector<1x256xf32>
    %38 = vector.broadcast %37 : vector<1x256xf32> to vector<128x256xf32>
    %39 = arith.addf %36, %38 : vector<128x256xf32>
    %cst_28 = arith.constant 5.000000e-01 : f32
    %40 = vector.broadcast %cst_28 : f32 to vector<128x256xf32>
    %41 = arith.mulf %40, %39 : vector<128x256xf32>
    %42 = math.tanh %41 : vector<128x256xf32>
    %cst_29 = arith.constant 5.000000e-01 : f32
    %43 = vector.broadcast %cst_29 : f32 to vector<128x256xf32>
    %44 = arith.mulf %43, %42 : vector<128x256xf32>
    %cst_30 = arith.constant 5.000000e-01 : f32
    %45 = vector.broadcast %cst_30 : f32 to vector<128x256xf32>
    %46 = arith.addf %44, %45 : vector<128x256xf32>
    %c0_31 = arith.constant 0 : index
    %c0_32 = arith.constant 0 : index
    %47 = vector.load %arg11[%c0_31, %c0_32] : memref<128x256xf32, #tpu.memory_space<vmem>>, vector<128x256xf32>
    tpu.vector_store %arg11[%c0_31, %c0_32], %46 {strides = array<i32>} : memref<128x256xf32, #tpu.memory_space<vmem>>, vector<128x256xf32>,
    return
  }
  func.func @transform_0(%arg0: i32) -> (i32, i32) {
    %c0_i32 = arith.constant 0 : i32
    %c0_i32_0 = arith.constant 0 : i32
    return %arg0, %c0_i32 : i32, i32
  }
  func.func @transform_1(%arg0: i32) -> (i32, i32) {
    %c0_i32 = arith.constant 0 : i32
    %c0_i32_0 = arith.constant 0 : i32
    return %arg0, %c0_i32 : i32, i32
  }
  func.func @transform_2(%arg0: i32) -> (i32, i32) {
    %c0_i32 = arith.constant 0 : i32
    %c0_i32_0 = arith.constant 0 : i32
    %c0_i32_1 = arith.constant 0 : i32
    return %c0_i32, %c0_i32_0 : i32, i32
  }
  func.func @transform_3(%arg0: i32) -> (i32, i32) {
    %c0_i32 = arith.constant 0 : i32
    %c0_i32_0 = arith.constant 0 : i32
    %c0_i32_1 = arith.constant 0 : i32
    return %c0_i32, %c0_i32_0 : i32, i32
  }
  func.func @transform_4(%arg0: i32) -> (i32, i32) {
    %c0_i32 = arith.constant 0 : i32
    %c0_i32_0 = arith.constant 0 : i32
    %c0_i32_1 = arith.constant 0 : i32
    return %c0_i32, %c0_i32_0 : i32, i32
  }
  func.func @transform_5(%arg0: i32) -> (i32, i32) {
    %c0_i32 = arith.constant 0 : i32
    %c0_i32_0 = arith.constant 0 : i32
    %c0_i32_1 = arith.constant 0 : i32
    return %c0_i32, %c0_i32_0 : i32, i32
  }
  func.func @transform_6(%arg0: i32) -> (i32, i32) {
    %c0_i32 = arith.constant 0 : i32
    %c0_i32_0 = arith.constant 0 : i32
    %c0_i32_1 = arith.constant 0 : i32
    return %c0_i32, %c0_i32_0 : i32, i32
  }
  func.func @transform_7(%arg0: i32) -> (i32, i32) {
    %c0_i32 = arith.constant 0 : i32
    %c0_i32_0 = arith.constant 0 : i32
    %c0_i32_1 = arith.constant 0 : i32
    return %c0_i32, %c0_i32_0 : i32, i32
  }
  func.func @transform_8(%arg0: i32) -> (i32, i32) {
    %c0_i32 = arith.constant 0 : i32
    %c0_i32_0 = arith.constant 0 : i32
    %c0_i32_1 = arith.constant 0 : i32
    return %c0_i32, %c0_i32_0 : i32, i32
  }
  func.func @transform_9(%arg0: i32) -> (i32, i32) {
    %c0_i32 = arith.constant 0 : i32
    %c0_i32_0 = arith.constant 0 : i32
    %c0_i32_1 = arith.constant 0 : i32
    return %c0_i32, %c0_i32_0 : i32, i32
  }
  func.func @transform_10(%arg0: i32) -> (i32, i32) {
    %c0_i32 = arith.constant 0 : i32
    %c0_i32_0 = arith.constant 0 : i32
    return %arg0, %c0_i32 : i32, i32
  }
  func.func @transform_11(%arg0: i32) -> (i32, i32) {
    %c0_i32 = arith.constant 0 : i32
    %c0_i32_0 = arith.constant 0 : i32
    return %arg0, %c0_i32 : i32, i32
  }
}

</mosaic_0001>

<bundles_post_ra>
// kernel: vae_forward.1
= control target key start
LH: loop header
LB: loop body
LE: loop exit
PB: predicated region body
PF: predicated region fallthrough
CT: control target
= control target key end

     0   :  { %s2659_s17 = smov 0   ;;  %s3417_s0 = inlined_call_operand.vmem [shape: f32[512,256], index: 0, kind: input, shape index: {}]   ;;  %s3418_s1 = inlined_call_operand.vmem [shape: f32[512,128], index: 1, kind: input, shape index: {}]   ;;  %s3419_s2 = inlined_call_operand.vmem [shape: bf16[256,256], index: 2, kind: input, shape index: {}]   ;;  %s3420_s3 = inlined_call_operand.vmem [shape: f32[1,256], index: 3, kind: input, shape index: {}]   ;;  %s3421_s4 = inlined_call_operand.vmem [shape: bf16[256,256], index: 4, kind: input, shape index: {}]   ;;  %s3422_s5 = inlined_call_operand.vmem [shape: f32[1,256], index: 5, kind: input, shape index: {}]   ;;  %s3423_s6 = inlined_call_operand.vmem [shape: bf16[128,256], index: 6, kind: input, shape index: {}]   ;;  %s3424_s7 = inlined_call_operand.vmem [shape: f32[1,256], index: 7, kind: input, shape index: {}]   ;;  %s3425_s8 = inlined_call_operand.vmem [shape: bf16[256,256], index: 8, kind: input, shape index: {}]   ;;  %s3426_s9 = inlined_call_operand.vmem [shape: f32[1,256], index: 9, kind: input, shape index: {}]   ;;  %s3427_s10 = inlined_call_operand.vmem [shape: f32[512,256], index: 10, kind: output, shape index: {0}]   ;;  %s3428_s11 = inlined_call_operand.vmem [shape: f32[512,256], index: 11, kind: output, shape index: {1}]  }
   0x1 LB: > { %s2184_s18 = sadd.s32 4294967295, %s2596_s17   ;;  %p2188_p0 = scmp.ge.s32.totalorder %s2596_s17, 1  ;;  %s2596_s17 = sphi %s2659_s17, %s22_s17  }
   0x2   : > { %p353_p1 = scmp.lt.s32.totalorder %s2596_s17, 5 }
   0x4   : > { %p354_p2 = pnand %p2188_p0, %p353_p1 }
   0x5   : > { %v2326_v0 = vld [vmem:[%s3419_s2 + $0x4] ss:$8 sps:$4 sm:$0xff] (!%p354_p2)   ;;  %v2328_v1 = vld [vmem:[%s3419_s2] ss:$8 sps:$4 sm:$0xff] (!%p354_p2)   ;;  %v2329_v2 = vld [vmem:[%s3419_s2 + $0x14] ss:$8 sps:$4 sm:$0xff] (!%p354_p2)  }
   0x6   : > { %357 = sbr.rel (%p354_p2) target bundleno = 1045 (0x415), region = 60  ;;  %686 = vmatprep.subr.bf16.mxu0 (!%p354_p2), %v2326_v0  ;;  %v2331_v3 = vld [vmem:[%s3419_s2 + $0x10] ss:$8 sps:$4 sm:$0xff] (!%p354_p2)   ;;  %v2332_v4 = vld [vmem:[%s3419_s2 + $0x24] ss:$8 sps:$4 sm:$0xff] (!%p354_p2)   ;;  %s2189_s29 = sshll.u32 (!%p354_p2), %s2184_s18, 4 }
   0x7   : > { %687 = vmatpush1.bf16.msra.mxu0 (!%p354_p2), %v2328_v1  ;;  %v2334_v5 = vld [vmem:[%s3419_s2 + $0x20] ss:$8 sps:$4 sm:$0xff] (!%p354_p2)   ;;  %p407_p3 = scmp.lt.s32.totalorder (!%p354_p2), %s2189_s29, 63  ;;  %v2335_v6 = vld [vmem:[%s3419_s2 + $0x34] ss:$8 sps:$4 sm:$0xff] (!%p354_p2)  }
   0x8   : > { %688 = vmatprep.subr.bf16.mxu0 (!%p354_p2), %v2329_v2  ;;  %v2337_v7 = vld [vmem:[%s3419_s2 + $0x30] ss:$8 sps:$4 sm:$0xff] (!%p354_p2)   ;;  %v2338_v8 = vld [vmem:[%s3419_s2 + $0x44] ss:$8 sps:$4 sm:$0xff] (!%p354_p2)   ;;  %v2340_v9 = vld [vmem:[%s3419_s2 + $0x40] ss:$8 sps:$4 sm:$0xff] (!%p354_p2)  }
   0x9   : > { %v2341_v10 = vld [vmem:[%s3419_s2 + $0x54] ss:$8 sps:$4 sm:$0xff] (!%p354_p2)   ;;  %v2343_v11 = vld [vmem:[%s3419_s2 + $0x50] ss:$8 sps:$4 sm:$0xff] (!%p354_p2)   ;;  %v2344_v12 = vld [vmem:[%s3419_s2 + $0x64] ss:$8 sps:$4 sm:$0xff] (!%p354_p2)  }
   0xa   : > { %v2346_v16 = vld [vmem:[%s3419_s2 + $0x60] ss:$8 sps:$4 sm:$0xff] (!%p354_p2)   ;;  %v2347_v17 = vld [vmem:[%s3419_s2 + $0x74] ss:$8 sps:$4 sm:$0xff] (!%p354_p2)   ;;  %v2349_v18 = vld [vmem:[%s3419_s2 + $0x70] ss:$8 sps:$4 sm:$0xff] (!%p354_p2)  }
   0xb   : > { %689 = vmatpush1.bf16.msra.mxu0 (!%p354_p2), %v2331_v3  ;;  %v2350_v19 = vld [vmem:[%s3419_s2 + $0x84] ss:$8 sps:$4 sm:$0xff] (!%p354_p2)   ;;  %v2352_v20 = vld [vmem:[%s3419_s2 + $0x80] ss:$8 sps:$4 sm:$0xff] (!%p354_p2)   ;;  %v2353_v21 = vld [vmem:[%s3419_s2 + $0x94] ss:$8 sps:$4 sm:$0xff] (!%p354_p2)  }
   0xc   : > { %690 = vmatprep.subr.bf16.mxu0 (!%p354_p2), %v2332_v4  ;;  %v2374_v22 = vld [vmem:[%s3421_s4 + $0x4] ss:$8 sps:$4 sm:$0xff] (!%p354_p2)   ;;  %v2376_v23 = vld [vmem:[%s3421_s4] ss:$8 sps:$4 sm:$0xff] (!%p354_p2)   ;;  %v2355_v24 = vld [vmem:[%s3419_s2 + $0x90] ss:$8 sps:$4 sm:$0xff] (!%p354_p2)  }
   0xd   : > { %s3430_s29 = smov (!%p407_p3, %s2189_s29), 63  ;;  %1051 = vmatprep.subr.bf16.mxu1 %v2374_v22  ;;  %v2377_v25 = vld [vmem:[%s3421_s4 + $0x14] ss:$8 sps:$4 sm:$0xff]   ;;  %v2356_v26 = vld [vmem:[%s3419_s2 + $0xa4] ss:$8 sps:$4 sm:$0xff]  }
   0xe   : > { %s2700_s22 = sshll.u32 %s3430_s29, 4  ;;  %1052 = vmatpush1.bf16.msra.mxu1 %v2376_v23  ;;  %v2379_v27 = vld [vmem:[%s3421_s4 + $0x10] ss:$8 sps:$4 sm:$0xff]   ;;  %v2380_v28 = vld [vmem:[%s3421_s4 + $0x24] ss:$8 sps:$4 sm:$0xff]   ;;  %s2193_s26 = sshll.u32 %s3430_s29, 3 }
   0xf   : > { %691 = vmatpush1.bf16.msra.mxu0 %v2334_v5  ;;  %s2709_s27 = scalar_lea.vmem %s3417_s0, %s2700_s22  ;;  %1053 = vmatprep.subr.bf16.mxu1 %v2377_v25  ;;  %v2358_v29 = vld [vmem:[%s3419_s2 + $0xa0] ss:$8 sps:$4 sm:$0xff]   ;;  %v2359_v30 = vld [vmem:[%s3419_s2 + $0xb4] ss:$8 sps:$4 sm:$0xff]   ;;  %v2361_v33 = vld [vmem:[%s3419_s2 + $0xb0] ss:$8 sps:$4 sm:$0xff]   ;;  %s3087_s19 = scalar_lea.vmem %s3428_s11, %s2700_s22 }
  0x10   : > { %692 = vmatprep.subr.bf16.mxu0 %v2335_v6  ;;  %v435_v13 = vld [vmem:[%s2709_s27 + $0x8] sm:$0xff]  ;;  %v437_v14 = vld [vmem:[%s2709_s27 + $0x18] sm:$0xff]  ;;  %v434_v50 = vld [vmem:[%s2709_s27] sm:$0xff]  ;;  %s3131_s12 = scalar_lea.vmem %s3418_s1, %s2193_s26  ;;  %s3356_s28 = scalar_lea.vmem %s3427_s10, %s2700_s22 }
  0x11   : > { %v467_v15 = vpack.c.bf16 %v437_v14, %v435_v13  ;;  %v2382_v31 = vld [vmem:[%s3421_s4 + $0x20] ss:$8 sps:$4 sm:$0xff]   ;;  %v2383_v32 = vld [vmem:[%s3421_s4 + $0x34] ss:$8 sps:$4 sm:$0xff]   ;;  %v2362_v34 = vld [vmem:[%s3419_s2 + $0xc4] ss:$8 sps:$4 sm:$0xff]  }
  0x12   : > { %1054 = vmatpush1.bf16.msra.mxu1 %v2379_v27  ;;  %v2385_v35 = vld [vmem:[%s3421_s4 + $0x30] ss:$8 sps:$4 sm:$0xff]   ;;  %v2386_v36 = vld [vmem:[%s3421_s4 + $0x44] ss:$8 sps:$4 sm:$0xff]   ;;  %v2364_v37 = vld [vmem:[%s3419_s2 + $0xc0] ss:$8 sps:$4 sm:$0xff]  }
  0x13   : > { %693 = vmatpush1.bf16.msra.mxu0 %v2337_v7  ;;  %718 = vmatprep.mubr.bf16.mxu0 %v467_v15  ;;  %v2365_v38 = vld [vmem:[%s3419_s2 + $0xd4] ss:$8 sps:$4 sm:$0xff]   ;;  %v2388_v39 = vld [vmem:[%s3421_s4 + $0x40] ss:$8 sps:$4 sm:$0xff]   ;;  %v2367_v41 = vld [vmem:[%s3419_s2 + $0xd0] ss:$8 sps:$4 sm:$0xff]  }
  0x14   : > { %694 = vmatprep.subr.bf16.mxu0 %v2338_v8  ;;  %1055 = vmatprep.subr.bf16.mxu1 %v2380_v28  ;;  %v2389_v40 = vld [vmem:[%s3421_s4 + $0x54] ss:$8 sps:$4 sm:$0xff]   ;;  %v2368_v42 = vld [vmem:[%s3419_s2 + $0xe4] ss:$8 sps:$4 sm:$0xff]   ;;  %v2391_v43 = vld [vmem:[%s3421_s4 + $0x50] ss:$8 sps:$4 sm:$0xff]  }
  0x15   : > { %v2392_v44 = vld [vmem:[%s3421_s4 + $0x64] ss:$8 sps:$4 sm:$0xff]   ;;  %v2370_v45 = vld [vmem:[%s3419_s2 + $0xe0] ss:$8 sps:$4 sm:$0xff]   ;;  %v2371_v47 = vld [vmem:[%s3419_s2 + $0xf4] ss:$8 sps:$4 sm:$0xff]  }
  0x16   : > { %1056 = vmatpush1.bf16.msra.mxu1 %v2382_v31  ;;  %v2394_v46 = vld [vmem:[%s3421_s4 + $0x60] ss:$8 sps:$4 sm:$0xff]   ;;  %v2395_v48 = vld [vmem:[%s3421_s4 + $0x74] ss:$8 sps:$4 sm:$0xff]   ;;  %v2373_v49 = vld [vmem:[%s3419_s2 + $0xf0] ss:$8 sps:$4 sm:$0xff]  }
  0x17   : > { %695 = vmatpush1.bf16.msra.mxu0 %v2340_v9  ;;  %1057 = vmatprep.subr.bf16.mxu1 %v2383_v32  ;;  %v436_v51 = vld [vmem:[%s2709_s27 + $0x10] sm:$0xff]  ;;  %v439_v53 = vld [vmem:[%s2709_s27 + $0x28] sm:$0xff]  ;;  %v441_v54 = vld [vmem:[%s2709_s27 + $0x38] sm:$0xff] }
  0x18   : > { %696 = vmatprep.subr.bf16.mxu0 %v2341_v10  ;;  %v2397_v52 = vld [vmem:[%s3421_s4 + $0x70] ss:$8 sps:$4 sm:$0xff]   ;;  %v2398_v55 = vld [vmem:[%s3421_s4 + $0x84] ss:$8 sps:$4 sm:$0xff]   ;;  %v2400_v56 = vld [vmem:[%s3421_s4 + $0x80] ss:$8 sps:$4 sm:$0xff]   ;;  %v466_v57 = vpack.c.bf16 %v436_v51, %v434_v50  ;;  %v469_v59 = vpack.c.bf16 %v441_v54, %v439_v53 }
  0x19   : > { %v2401_v58 = vld [vmem:[%s3421_s4 + $0x94] ss:$8 sps:$4 sm:$0xff]   ;;  %v438_v60 = vld [vmem:[%s2709_s27 + $0x20] sm:$0xff]  ;;  %v2403_v62 = vld [vmem:[%s3421_s4 + $0x90] ss:$8 sps:$4 sm:$0xff]  }
  0x1a   : > { %1058 = vmatpush1.bf16.msra.mxu1 %v2385_v35  ;;  %v440_v61 = vld [vmem:[%s2709_s27 + $0x30] sm:$0xff]  ;;  %v443_v63 = vld [vmem:[%s2709_s27 + $0x48] sm:$0xff]  ;;  %v445_v0 = vld [vmem:[%s2709_s27 + $0x58] sm:$0xff] }
  0x1b   : > { %697 = vmatpush1.bf16.msra.mxu0 %v2343_v11  ;;  %1059 = vmatprep.subr.bf16.mxu1 %v2386_v36  ;;  %v2404_v1 = vld [vmem:[%s3421_s4 + $0xa4] ss:$8 sps:$4 sm:$0xff]   ;;  %v468_v2 = vpack.c.bf16 %v440_v61, %v438_v60  ;;  %v471_v3 = vpack.c.bf16 %v445_v0, %v443_v63  ;;  %v2406_v4 = vld [vmem:[%s3421_s4 + $0xa0] ss:$8 sps:$4 sm:$0xff]   ;;  %v2407_v5 = vld [vmem:[%s3421_s4 + $0xb4] ss:$8 sps:$4 sm:$0xff]  }
  0x1c   : > { %698 = vmatprep.subr.bf16.mxu0 %v2344_v12  ;;  %v442_v6 = vld [vmem:[%s2709_s27 + $0x40] sm:$0xff]  ;;  %v444_v7 = vld [vmem:[%s2709_s27 + $0x50] sm:$0xff]  ;;  %v447_v9 = vld [vmem:[%s2709_s27 + $0x68] sm:$0xff] }
  0x1d   : > { %v2409_v8 = vld [vmem:[%s3421_s4 + $0xb0] ss:$8 sps:$4 sm:$0xff]   ;;  %v2410_v11 = vld [vmem:[%s3421_s4 + $0xc4] ss:$8 sps:$4 sm:$0xff]   ;;  %v470_v12 = vpack.c.bf16 %v444_v7, %v442_v6  ;;  %v2412_v14 = vld [vmem:[%s3421_s4 + $0xc0] ss:$8 sps:$4 sm:$0xff]  }
  0x1e   : > { %1060 = vmatpush1.bf16.msra.mxu1 %v2388_v39  ;;  %v449_v10 = vld [vmem:[%s2709_s27 + $0x78] sm:$0xff]  ;;  %v450_v22 = vld [vmem:[%s2709_s27 + $0x80] sm:$0xff]  ;;  %v452_v23 = vld [vmem:[%s2709_s27 + $0x90] sm:$0xff] }
  0x1f   : > { %699 = vmatpush1.bf16.msra.mxu0 %v2346_v16  ;;  %1061 = vmatprep.subr.bf16.mxu1 %v2389_v40  ;;  %v473_v13 = vpack.c.bf16 %v449_v10, %v447_v9  ;;  %v2413_v15 = vld [vmem:[%s3421_s4 + $0xd4] ss:$8 sps:$4 sm:$0xff]   ;;  %v446_v16 = vld [vmem:[%s2709_s27 + $0x60] sm:$0xff]  ;;  %v463_v36 = vld [vmem:[%s2709_s27 + $0xe8] sm:$0xff] }
  0x20   : > { %700 = vmatprep.subr.bf16.mxu0 %v2347_v17  ;;  %v448_v17 = vld [vmem:[%s2709_s27 + $0x70] sm:$0xff]  ;;  %v457_v25 = vld [vmem:[%s2709_s27 + $0xb8] sm:$0xff]  ;;  %v454_v28 = vld [vmem:[%s2709_s27 + $0xa0] sm:$0xff] }
  0x21   : > { %v461_v31 = vld [vmem:[%s2709_s27 + $0xd8] sm:$0xff]  ;;  %v460_v35 = vld [vmem:[%s2709_s27 + $0xd0] sm:$0xff]  ;;  %v462_v40 = vld [vmem:[%s2709_s27 + $0xe0] sm:$0xff] }
  0x22   : > { %1062 = vmatpush1.bf16.msra.mxu1 %v2391_v43  ;;  %v2415_v43 = vld [vmem:[%s3421_s4 + $0xd0] ss:$8 sps:$4 sm:$0xff]   ;;  %v2427_v50 = vld [vmem:[%s3423_s6 + $0x14] ss:$8 sps:$4 sm:$0xff]   ;;  %v2428_v53 = vld [vmem:[%s3423_s6 + $0x20] ss:$8 sps:$4 sm:$0xff]  }
  0x23   : > { %701 = vmatpush1.bf16.msra.mxu0 %v2349_v18  ;;  %1063 = vmatprep.subr.bf16.mxu1 %v2392_v44  ;;  %v451_v18 = vld [vmem:[%s2709_s27 + $0x88] sm:$0xff]  ;;  %v2425_v51 = vld [vmem:[%s3423_s6 + $0x10] ss:$8 sps:$4 sm:$0xff]   ;;  %v2433_v54 = vld [vmem:[%s3423_s6 + $0x34] ss:$8 sps:$4 sm:$0xff]  }
  0x24   : > { %702 = vmatprep.subr.bf16.mxu0 %v2350_v19  ;;  %v453_v19 = vld [vmem:[%s2709_s27 + $0x98] sm:$0xff]  ;;  %v2416_v44 = vld [vmem:[%s3421_s4 + $0xe4] ss:$8 sps:$4 sm:$0xff]   ;;  %v514_v61 = vld [vmem:[%s3420_s3] sm:$0x3] }
  0x26   : > { %1064 = vmatpush1.bf16.msra.mxu1 %v2394_v46  ;;  %v2419_v46 = vld [vmem:[%s3421_s4 + $0xf4] ss:$8 sps:$4 sm:$0xff]  }
  0x27   : > { %703 = vmatpush1.bf16.msra.mxu0 %v2352_v20  ;;  %1065 = vmatprep.subr.bf16.mxu1 %v2395_v48  ;;  %v472_v20 = vpack.c.bf16 %v448_v17, %v446_v16  ;;  %v2422_v48 = vld [vmem:[%s3423_s6] ss:$8 sps:$4 sm:$0xff]  }
  0x28   : > { %704 = vmatprep.subr.bf16.mxu0 %v2353_v21  ;;  %v475_v21 = vpack.c.bf16 %v453_v19, %v451_v18 }
  0x2a   : > { %1066 = vmatpush1.bf16.msra.mxu1 %v2397_v52  ;;  %v2430_v52 = vld [vmem:[%s3423_s6 + $0x24] ss:$8 sps:$4 sm:$0xff]  }
  0x2b   : > { %705 = vmatpush1.bf16.msra.mxu0 %v2355_v24  ;;  %1067 = vmatprep.subr.bf16.mxu1 %v2398_v55  ;;  %v455_v24 = vld [vmem:[%s2709_s27 + $0xa8] sm:$0xff]  ;;  %v2431_v55 = vld [vmem:[%s3423_s6 + $0x30] ss:$8 sps:$4 sm:$0xff]  }
  0x2c   : > { %706 = vmatprep.subr.bf16.mxu0 %v2356_v26  ;;  %v474_v26 = vpack.c.bf16 %v452_v23, %v450_v22  ;;  %v477_v27 = vpack.c.bf16 %v457_v25, %v455_v24 }
  0x2e   : > { %1068 = vmatpush1.bf16.msra.mxu1 %v2400_v56  ;;  %v2436_v56 = vld [vmem:[%s3423_s6 + $0x44] ss:$8 sps:$4 sm:$0xff]  }
  0x2f   : > { %707 = vmatpush1.bf16.msra.mxu0 %v2358_v29  ;;  %1069 = vmatprep.subr.bf16.mxu1 %v2401_v58  ;;  %v456_v29 = vld [vmem:[%s2709_s27 + $0xb0] sm:$0xff]  ;;  %v516_v58 = vlaneseq }
  0x30   : > { %708 = vmatprep.subr.bf16.mxu0 %v2359_v30  ;;  %v459_v30 = vld [vmem:[%s2709_s27 + $0xc8] sm:$0xff]  ;;  %v476_v32 = vpack.c.bf16 %v456_v29, %v454_v28 }
  0x32   : > { %1070 = vmatpush1.bf16.msra.mxu1 %v2403_v62 }
  0x33   : > { %709 = vmatpush1.bf16.msra.mxu0 %v2361_v33  ;;  %1071 = vmatprep.subr.bf16.mxu1 %v2404_v1  ;;  %v479_v33 = vpack.c.bf16 %v461_v31, %v459_v30 }
  0x34   : > { %710 = vmatprep.subr.bf16.mxu0 %v2362_v34  ;;  %v458_v34 = vld [vmem:[%s2709_s27 + $0xc0] sm:$0xff] }
  0x36   : > { %1072 = vmatpush1.bf16.msra.mxu1 %v2406_v4 }
  0x37   : > { %711 = vmatpush1.bf16.msra.mxu0 %v2364_v37  ;;  %1073 = vmatprep.subr.bf16.mxu1 %v2407_v5  ;;  %v465_v37 = vld [vmem:[%s2709_s27 + $0xf8] sm:$0xff] }
  0x38   : > { %712 = vmatprep.subr.bf16.mxu0 %v2365_v38  ;;  %v478_v38 = vpack.c.bf16 %v460_v35, %v458_v34  ;;  %v481_v39 = vpack.c.bf16 %v465_v37, %v463_v36 }
  0x3a   : > { %1074 = vmatpush1.bf16.msra.mxu1 %v2409_v8 }
  0x3b   : > { %713 = vmatpush1.bf16.msra.mxu0 %v2367_v41  ;;  %1075 = vmatprep.subr.bf16.mxu1 %v2410_v11  ;;  %v464_v41 = vld [vmem:[%s2709_s27 + $0xf0] sm:$0xff] }
  0x3c   : > { %714 = vmatprep.subr.bf16.mxu0 %v2368_v42  ;;  %v480_v42 = vpack.c.bf16 %v464_v41, %v462_v40 }
  0x3e   : > { %1076 = vmatpush1.bf16.msra.mxu1 %v2412_v14 }
  0x3f   : > { %715 = vmatpush1.bf16.msra.mxu0 %v2370_v45  ;;  %1077 = vmatprep.subr.bf16.mxu1 %v2413_v15  ;;  %v2418_v45 = vld [vmem:[%s3421_s4 + $0xe0] ss:$8 sps:$4 sm:$0xff]  }
  0x40   : > { %716 = vmatprep.subr.bf16.mxu0 %v2371_v47  ;;  %v2421_v47 = vld [vmem:[%s3421_s4 + $0xf0] ss:$8 sps:$4 sm:$0xff]  }
  0x42   : > { %1078 = vmatpush1.bf16.msra.mxu1 %v2415_v43 }
  0x43   : > { %717 = vmatpush1.bf16.msra.mxu0 %v2373_v49  ;;  %1079 = vmatprep.subr.bf16.mxu1 %v2416_v44  ;;  %v2424_v49 = vld [vmem:[%s3423_s6 + $0x4] ss:$8 sps:$4 sm:$0xff]  }
  0x44   : > { %1440 = vmatprep.subr.bf16.mxu0 %v2424_v49 }
  0x46   : > { %719 = vmatmul.mubr.bf16.vlgmr.msra.gmra.mrb[0].mxu0 %v466_v57  ;;  %1080 = vmatpush1.bf16.msra.mxu1 %v2418_v45  ;;  %v2434_v57 = vld [vmem:[%s3423_s6 + $0x40] ss:$8 sps:$4 sm:$0xff]  }
  0x47   : > { %728 = vmatprep.mubr.bf16.mxu0 %v469_v59  ;;  %1081 = vmatprep.subr.bf16.mxu1 %v2419_v46  ;;  %v517_v59 = vshrl.u32 %v516_v58, 7 }
  0x48   : > { %1441 = vmatpush1.bf16.msra.mxu0 %v2422_v48 }
  0x49   : > { %1442 = vmatprep.subr.bf16.mxu0 %v2427_v50  ;;  %v2932_v60 = vsub.s32 0, %v517_v59  ;;  %v2937_v62 = vsub.s32 1, %v517_v59 }
  0x4a   : > { %1082 = vmatpush1.bf16.msra.mxu1 %v2421_v47 }
  0x4b   : > { %v2940_v63 = vrot.slane %v514_v61, %v2932_v60  ;;  %v2943_v0 = vrot.slane %v514_v61, %v2937_v62 }
  0x4c   : > { %1443 = vmatpush1.bf16.msra.mxu0 %v2425_v51 }
  0x4d   : > { %1444 = vmatprep.subr.bf16.mxu0 %v2430_v52 }
  0x4e   : > { %729 = vmatmul.mubr.bf16.gmra.mrb[4].mxu0 %v468_v2 }
  0x4f   : > { %738 = vmatprep.mubr.bf16.mxu0 %v471_v3 }
  0x50   : > { %1445 = vmatpush1.bf16.msra.mxu0 %v2428_v53 }
  0x51   : > { %1446 = vmatprep.subr.bf16.mxu0 %v2433_v54 }
  0x54   : > { %1447 = vmatpush1.bf16.msra.mxu0 %v2431_v55 }
  0x55   : > { %1448 = vmatprep.subr.bf16.mxu0 %v2436_v56 }
  0x56   : > { %739 = vmatmul.mubr.bf16.gmra.mrb[8].mxu0 %v470_v12 }
  0x57   : > { %748 = vmatprep.mubr.bf16.mxu0 %v473_v13 }
  0x58   : > { %1449 = vmatpush1.bf16.msra.mxu0 %v2434_v57 }
  0x5e   : > { %749 = vmatmul.mubr.bf16.gmra.mrb[12].mxu0 %v472_v20 }
  0x5f   : > { %758 = vmatprep.mubr.bf16.mxu0 %v475_v21 }
  0x66   : > { %759 = vmatmul.mubr.bf16.gmra.mrb[16].mxu0 %v474_v26 }
  0x67   : > { %768 = vmatprep.mubr.bf16.mxu0 %v477_v27 }
  0x6e   : > { %769 = vmatmul.mubr.bf16.gmra.mrb[20].mxu0 %v476_v32 }
  0x6f   : > { %778 = vmatprep.mubr.bf16.mxu0 %v479_v33 }
  0x76   : > { %779 = vmatmul.mubr.bf16.gmra.mrb[24].mxu0 %v478_v38 }
  0x77   : > { %788 = vmatprep.mubr.bf16.mxu0 %v481_v39 }
  0x7e   : > { %789 = vmatmul.mubr.bf16.gmra.mrb[28].mxu0 %v480_v42 }
 0x119   : > { %v720_v1 = vpop.f32.mrb[0].mxu0 }
 0x11a   : > { %v721_v2 = vadd.f32 %v720_v1, %v2940_v63  ;;  %v722_v3 = vpop.f32.mrb[1].mxu0 }
 0x11b   : > { %v723_v4 = vadd.f32 %v722_v3, %v2943_v0  ;;  %v724_v5 = vpop.f32.mrb[2].mxu0 }
 0x11c   : > { %v725_v6 = vadd.f32 %v724_v5, %v2940_v63  ;;  %v726_v7 = vpop.f32.mrb[3].mxu0  ;;  %v799_v9 = vmax.f32 %v721_v2, 0.0 }
 0x11d   : > { %v727_v8 = vadd.f32 %v726_v7, %v2943_v0  ;;  %v800_v11 = vmax.f32 %v723_v4, 0.0 }
 0x11e   : > { %v801_v10 = vmax.f32 %v725_v6, 0.0 }
 0x11f   : > { %v802_v12 = vmax.f32 %v727_v8, 0.0 }
 0x120   : > { %v831_v13 = vpack.c.bf16 %v801_v10, %v799_v9 }
 0x121   : > { %v730_v14 = vpop.f32.mrb[4].mxu0  ;;  %v832_v15 = vpack.c.bf16 %v802_v12, %v800_v11 }
 0x122   : > { %v731_v16 = vadd.f32 %v730_v14, %v2940_v63  ;;  %v732_v17 = vpop.f32.mrb[5].mxu0 }
 0x123   : > { %v733_v18 = vadd.f32 %v732_v17, %v2943_v0  ;;  %v734_v19 = vpop.f32.mrb[6].mxu0  ;;  %1083 = vmatprep.mubr.bf16.mxu1 %v832_v15 }
 0x124   : > { %v735_v20 = vadd.f32 %v734_v19, %v2940_v63  ;;  %v736_v21 = vpop.f32.mrb[7].mxu0  ;;  %1084 = vmatmul.mubr.bf16.vlgmr.msra.gmra.mrb[0].mxu1 %v831_v13  ;;  %v803_v23 = vmax.f32 %v731_v16, 0.0 }
 0x125   : > { %v737_v22 = vadd.f32 %v736_v21, %v2943_v0  ;;  %v804_v25 = vmax.f32 %v733_v18, 0.0 }
 0x126   : > { %v805_v24 = vmax.f32 %v735_v20, 0.0 }
 0x127   : > { %v806_v26 = vmax.f32 %v737_v22, 0.0 }
 0x128   : > { %v833_v27 = vpack.c.bf16 %v805_v24, %v803_v23 }
 0x129   : > { %v834_v28 = vpack.c.bf16 %v806_v26, %v804_v25  ;;  %v740_v29 = vpop.f32.mrb[8].mxu0 }
 0x12a   : > { %v741_v30 = vadd.f32 %v740_v29, %v2940_v63  ;;  %v742_v31 = vpop.f32.mrb[9].mxu0 }
 0x12b   : > { %v743_v32 = vadd.f32 %v742_v31, %v2943_v0  ;;  %v744_v33 = vpop.f32.mrb[10].mxu0  ;;  %1093 = vmatprep.mubr.bf16.mxu1 %v834_v28 }
 0x12c   : > { %v745_v34 = vadd.f32 %v744_v33, %v2940_v63  ;;  %v746_v35 = vpop.f32.mrb[11].mxu0  ;;  %1094 = vmatmul.mubr.bf16.gmra.mrb[4].mxu1 %v833_v27  ;;  %v807_v37 = vmax.f32 %v741_v30, 0.0 }
 0x12d   : > { %v747_v36 = vadd.f32 %v746_v35, %v2943_v0  ;;  %v808_v39 = vmax.f32 %v743_v32, 0.0 }
 0x12e   : > { %v809_v38 = vmax.f32 %v745_v34, 0.0 }
 0x12f   : > { %v810_v40 = vmax.f32 %v747_v36, 0.0 }
 0x130   : > { %v835_v41 = vpack.c.bf16 %v809_v38, %v807_v37 }
 0x131   : > { %v836_v42 = vpack.c.bf16 %v810_v40, %v808_v39  ;;  %v750_v43 = vpop.f32.mrb[12].mxu0 }
 0x132   : > { %v751_v44 = vadd.f32 %v750_v43, %v2940_v63  ;;  %v752_v45 = vpop.f32.mrb[13].mxu0 }
 0x133   : > { %v753_v46 = vadd.f32 %v752_v45, %v2943_v0  ;;  %v754_v47 = vpop.f32.mrb[14].mxu0  ;;  %1103 = vmatprep.mubr.bf16.mxu1 %v836_v42 }
 0x134   : > { %v755_v48 = vadd.f32 %v754_v47, %v2940_v63  ;;  %v756_v49 = vpop.f32.mrb[15].mxu0  ;;  %1104 = vmatmul.mubr.bf16.gmra.mrb[8].mxu1 %v835_v41  ;;  %v811_v51 = vmax.f32 %v751_v44, 0.0 }
 0x135   : > { %v757_v50 = vadd.f32 %v756_v49, %v2943_v0  ;;  %v812_v53 = vmax.f32 %v753_v46, 0.0 }
 0x136   : > { %v813_v52 = vmax.f32 %v755_v48, 0.0 }
 0x137   : > { %v814_v54 = vmax.f32 %v757_v50, 0.0 }
 0x138   : > { %v837_v55 = vpack.c.bf16 %v813_v52, %v811_v51 }
 0x139   : > { %v838_v56 = vpack.c.bf16 %v814_v54, %v812_v53  ;;  %v760_v57 = vpop.f32.mrb[16].mxu0  ;;  %v2439_v53 = vld [vmem:[%s3423_s6 + $0x54] ss:$8 sps:$4 sm:$0xff]   ;;  %v2440_v54 = vld [vmem:[%s3423_s6 + $0x60] ss:$8 sps:$4 sm:$0xff]  }
 0x13a   : > { %v761_v58 = vadd.f32 %v760_v57, %v2940_v63  ;;  %v762_v59 = vpop.f32.mrb[17].mxu0  ;;  %1450 = vmatprep.subr.bf16.mxu0 %v2439_v53  ;;  %v2598_v57 = vmov 0  }
 0x13b   : > { %v763_v61 = vadd.f32 %v762_v59, %v2943_v0  ;;  %v764_v1 = vpop.f32.mrb[18].mxu0  ;;  %1113 = vmatprep.mubr.bf16.mxu1 %v838_v56  ;;  %v2443_v56 = vld [vmem:[%s3423_s6 + $0x70] ss:$8 sps:$4 sm:$0xff]   ;;  %1472 = vmatprep.mubr.bf16.mxu0 %v2598_v57  ;;  %v2448_v59 = vld [vmem:[%s3425_s8 + $0x4] ss:$8 sps:$4 sm:$0xff]  }
 0x13c   : > { %v765_v2 = vadd.f32 %v764_v1, %v2940_v63  ;;  %v766_v3 = vpop.f32.mrb[19].mxu0  ;;  %1114 = vmatmul.mubr.bf16.gmra.mrb[12].mxu1 %v837_v55  ;;  %v815_v5 = vmax.f32 %v761_v58, 0.0  ;;  %v2445_v55 = vld [vmem:[%s3423_s6 + $0x74] ss:$8 sps:$4 sm:$0xff]   ;;  %v2446_v58 = vld [vmem:[%s3425_s8] ss:$8 sps:$4 sm:$0xff]   ;;  %1805 = vmatprep.subr.bf16.mxu1 %v2448_v59 }
 0x13d   : > { %v767_v4 = vadd.f32 %v766_v3, %v2943_v0  ;;  %v816_v7 = vmax.f32 %v763_v61, 0.0  ;;  %v2451_v61 = vld [vmem:[%s3425_s8 + $0x14] ss:$8 sps:$4 sm:$0xff]   ;;  %1806 = vmatpush1.bf16.msra.mxu1 %v2446_v58  ;;  %v2449_v1 = vld [vmem:[%s3425_s8 + $0x10] ss:$8 sps:$4 sm:$0xff]  }
 0x13e   : > { %v817_v6 = vmax.f32 %v765_v2, 0.0  ;;  %1807 = vmatprep.subr.bf16.mxu1 %v2451_v61  ;;  %v2454_v2 = vld [vmem:[%s3425_s8 + $0x24] ss:$8 sps:$4 sm:$0xff]   ;;  %v2452_v3 = vld [vmem:[%s3425_s8 + $0x20] ss:$8 sps:$4 sm:$0xff]  }
 0x13f   : > { %v818_v8 = vmax.f32 %v767_v4, 0.0  ;;  %v2457_v4 = vld [vmem:[%s3425_s8 + $0x34] ss:$8 sps:$4 sm:$0xff]  }
 0x140   : > { %v839_v9 = vpack.c.bf16 %v817_v6, %v815_v5  ;;  %v2455_v5 = vld [vmem:[%s3425_s8 + $0x30] ss:$8 sps:$4 sm:$0xff]   ;;  %v2460_v6 = vld [vmem:[%s3425_s8 + $0x44] ss:$8 sps:$4 sm:$0xff]  }
 0x141   : > { %v840_v10 = vpack.c.bf16 %v818_v8, %v816_v7  ;;  %v770_v11 = vpop.f32.mrb[20].mxu0  ;;  %1808 = vmatpush1.bf16.msra.mxu1 %v2449_v1  ;;  %v2458_v7 = vld [vmem:[%s3425_s8 + $0x40] ss:$8 sps:$4 sm:$0xff]   ;;  %v2463_v8 = vld [vmem:[%s3425_s8 + $0x54] ss:$8 sps:$4 sm:$0xff]  }
 0x142   : > { %v771_v12 = vadd.f32 %v770_v11, %v2940_v63  ;;  %v772_v13 = vpop.f32.mrb[21].mxu0  ;;  %1809 = vmatprep.subr.bf16.mxu1 %v2454_v2  ;;  %v2464_v11 = vld [vmem:[%s3425_s8 + $0x60] ss:$8 sps:$4 sm:$0xff]  }
 0x143   : > { %v773_v14 = vadd.f32 %v772_v13, %v2943_v0  ;;  %v774_v15 = vpop.f32.mrb[22].mxu0  ;;  %1123 = vmatprep.mubr.bf16.mxu1 %v840_v10  ;;  %v2466_v10 = vld [vmem:[%s3425_s8 + $0x64] ss:$8 sps:$4 sm:$0xff]   ;;  %v2467_v13 = vld [vmem:[%s3425_s8 + $0x70] ss:$8 sps:$4 sm:$0xff]  }
 0x144   : > { %v775_v16 = vadd.f32 %v774_v15, %v2940_v63  ;;  %v776_v17 = vpop.f32.mrb[23].mxu0  ;;  %1124 = vmatmul.mubr.bf16.gmra.mrb[16].mxu1 %v839_v9  ;;  %v819_v19 = vmax.f32 %v771_v12, 0.0  ;;  %v2461_v9 = vld [vmem:[%s3425_s8 + $0x50] ss:$8 sps:$4 sm:$0xff]   ;;  %v2469_v12 = vld [vmem:[%s3425_s8 + $0x74] ss:$8 sps:$4 sm:$0xff]  }
 0x145   : > { %v777_v18 = vadd.f32 %v776_v17, %v2943_v0  ;;  %v820_v21 = vmax.f32 %v773_v14, 0.0  ;;  %1810 = vmatpush1.bf16.msra.mxu1 %v2452_v3  ;;  %v2472_v14 = vld [vmem:[%s3425_s8 + $0x84] ss:$8 sps:$4 sm:$0xff]   ;;  %v2470_v15 = vld [vmem:[%s3425_s8 + $0x80] ss:$8 sps:$4 sm:$0xff]  }
 0x146   : > { %v821_v20 = vmax.f32 %v775_v16, 0.0  ;;  %1811 = vmatprep.subr.bf16.mxu1 %v2457_v4  ;;  %v2475_v16 = vld [vmem:[%s3425_s8 + $0x94] ss:$8 sps:$4 sm:$0xff]   ;;  %v2473_v17 = vld [vmem:[%s3425_s8 + $0x90] ss:$8 sps:$4 sm:$0xff]   ;;  %v1228_v2 = vld [vmem:[%s3131_s12] sm:$0xff] }
 0x147   : > { %v822_v22 = vmax.f32 %v777_v18, 0.0  ;;  %v2478_v18 = vld [vmem:[%s3425_s8 + $0xa4] ss:$8 sps:$4 sm:$0xff]  }
 0x148   : > { %v841_v23 = vpack.c.bf16 %v821_v20, %v819_v19  ;;  %v879_v19 = vld [vmem:[%s3422_s5] sm:$0x3] }
 0x149   : > { %v842_v24 = vpack.c.bf16 %v822_v22, %v820_v21  ;;  %v780_v25 = vpop.f32.mrb[24].mxu0  ;;  %1812 = vmatpush1.bf16.msra.mxu1 %v2455_v5  ;;  %v2476_v20 = vld [vmem:[%s3425_s8 + $0xa0] ss:$8 sps:$4 sm:$0xff]   ;;  %v3066_v21 = vrot.slane %v879_v19, %v2932_v60  ;;  %v2481_v22 = vld [vmem:[%s3425_s8 + $0xb4] ss:$8 sps:$4 sm:$0xff]  }
 0x14a   : > { %v781_v26 = vadd.f32 %v780_v25, %v2940_v63  ;;  %v782_v27 = vpop.f32.mrb[25].mxu0  ;;  %1813 = vmatprep.subr.bf16.mxu1 %v2460_v6  ;;  %v2479_v25 = vld [vmem:[%s3425_s8 + $0xb0] ss:$8 sps:$4 sm:$0xff]  }
 0x14b   : > { %v783_v28 = vadd.f32 %v782_v27, %v2943_v0  ;;  %v784_v29 = vpop.f32.mrb[26].mxu0  ;;  %1133 = vmatprep.mubr.bf16.mxu1 %v842_v24 }
 0x14c   : > { %v785_v30 = vadd.f32 %v784_v29, %v2940_v63  ;;  %v786_v31 = vpop.f32.mrb[27].mxu0  ;;  %1134 = vmatmul.mubr.bf16.gmra.mrb[20].mxu1 %v841_v23  ;;  %v823_v33 = vmax.f32 %v781_v26, 0.0  ;;  %v3072_v23 = vrot.slane %v879_v19, %v2937_v62 }
 0x14d   : > { %v787_v32 = vadd.f32 %v786_v31, %v2943_v0  ;;  %v824_v35 = vmax.f32 %v783_v28, 0.0  ;;  %1814 = vmatpush1.bf16.msra.mxu1 %v2458_v7  ;;  %v2484_v28 = vld [vmem:[%s3425_s8 + $0xc4] ss:$8 sps:$4 sm:$0xff]  }
 0x14e   : > { %v825_v34 = vmax.f32 %v785_v30, 0.0  ;;  %1815 = vmatprep.subr.bf16.mxu1 %v2463_v8 }
 0x14f   : > { %v826_v36 = vmax.f32 %v787_v32, 0.0 }
 0x150   : > { %v843_v37 = vpack.c.bf16 %v825_v34, %v823_v33 }
 0x151   : > { %v844_v38 = vpack.c.bf16 %v826_v36, %v824_v35  ;;  %v790_v39 = vpop.f32.mrb[28].mxu0  ;;  %1816 = vmatpush1.bf16.msra.mxu1 %v2461_v9  ;;  %v2482_v36 = vld [vmem:[%s3425_s8 + $0xc0] ss:$8 sps:$4 sm:$0xff]  }
 0x152   : > { %v791_v40 = vadd.f32 %v790_v39, %v2940_v63  ;;  %v792_v41 = vpop.f32.mrb[29].mxu0  ;;  %1817 = vmatprep.subr.bf16.mxu1 %v2466_v10  ;;  %v1229_v10 = vld [vmem:[%s3131_s12 + $0x8] sm:$0xff] }
 0x153   : > { %v793_v42 = vadd.f32 %v792_v41, %v2943_v0  ;;  %v794_v43 = vpop.f32.mrb[30].mxu0  ;;  %1143 = vmatprep.mubr.bf16.mxu1 %v844_v38  ;;  %v2487_v38 = vld [vmem:[%s3425_s8 + $0xd4] ss:$8 sps:$4 sm:$0xff]  }
 0x154   : > { %v795_v44 = vadd.f32 %v794_v43, %v2940_v63  ;;  %v796_v45 = vpop.f32.mrb[31].mxu0  ;;  %1144 = vmatmul.mubr.bf16.gmra.mrb[24].mxu1 %v843_v37  ;;  %v827_v47 = vmax.f32 %v791_v40, 0.0  ;;  %v2437_v63 = vld [vmem:[%s3423_s6 + $0x50] ss:$8 sps:$4 sm:$0xff]  }
 0x155   : > { %v797_v46 = vadd.f32 %v796_v45, %v2943_v0  ;;  %v828_v49 = vmax.f32 %v793_v42, 0.0  ;;  %1451 = vmatpush1.bf16.msra.mxu0 %v2437_v63  ;;  %v2442_v0 = vld [vmem:[%s3423_s6 + $0x64] ss:$8 sps:$4 sm:$0xff]   ;;  %1818 = vmatpush1.bf16.msra.mxu1 %v2464_v11 }
 0x156   : > { %v829_v48 = vmax.f32 %v795_v44, 0.0  ;;  %1452 = vmatprep.subr.bf16.mxu0 %v2442_v0  ;;  %1819 = vmatprep.subr.bf16.mxu1 %v2469_v12  ;;  %v2485_v44 = vld [vmem:[%s3425_s8 + $0xd0] ss:$8 sps:$4 sm:$0xff]  }
 0x157   : > { %v830_v50 = vmax.f32 %v797_v46, 0.0 }
 0x158   : > { %v845_v51 = vpack.c.bf16 %v829_v48, %v827_v47 }
 0x159   : > { %v846_v52 = vpack.c.bf16 %v830_v50, %v828_v49  ;;  %1453 = vmatpush1.bf16.msra.mxu0 %v2440_v54  ;;  %1820 = vmatpush1.bf16.msra.mxu1 %v2467_v13 }
 0x15a   : > { %1454 = vmatprep.subr.bf16.mxu0 %v2445_v55  ;;  %1821 = vmatprep.subr.bf16.mxu1 %v2472_v14 }
 0x15b   : > { %1153 = vmatprep.mubr.bf16.mxu1 %v846_v52 }
 0x15c   : > { %1154 = vmatmul.mubr.bf16.gmra.mrb[28].mxu1 %v845_v51 }
 0x15d   : > { %1455 = vmatpush1.bf16.msra.mxu0 %v2443_v56  ;;  %1822 = vmatpush1.bf16.msra.mxu1 %v2470_v15 }
 0x15e   : > { %1823 = vmatprep.subr.bf16.mxu1 %v2475_v16 }
 0x161   : > { %1824 = vmatpush1.bf16.msra.mxu1 %v2473_v17 }
 0x162   : > { %1825 = vmatprep.subr.bf16.mxu1 %v2478_v18 }
 0x165   : > { %1826 = vmatpush1.bf16.msra.mxu1 %v2476_v20 }
 0x166   : > { %1827 = vmatprep.subr.bf16.mxu1 %v2481_v22 }
 0x169   : > { %1828 = vmatpush1.bf16.msra.mxu1 %v2479_v25 }
 0x16a   : > { %1829 = vmatprep.subr.bf16.mxu1 %v2484_v28 }
 0x16d   : > { %1830 = vmatpush1.bf16.msra.mxu1 %v2482_v36 }
 0x16e   : > { %1831 = vmatprep.subr.bf16.mxu1 %v2487_v38 }
 0x171   : > { %1832 = vmatpush1.bf16.msra.mxu1 %v2485_v44 }
 0x1f7   : > { %v1085_v24 = vpop.f32.mrb[0].mxu1 }
 0x1f8   : > { %v3078_v26 = vadd.f32 %v1085_v24, %v3066_v21  ;;  %v1087_v27 = vpop.f32.mrb[1].mxu1 }
 0x1f9   : > { %v1088_v29 = vadd.f32 %v1087_v27, %v3072_v23  ;;  %v1089_v30 = vpop.f32.mrb[2].mxu1 }
 0x1fa   : > { %v1164_v31 = vmax.f32 %v3078_v26, 0.0  ;;  %v3092_v32 = vadd.f32 %v1089_v30, %v3066_v21  ;;  %v1091_v33 = vpop.f32.mrb[3].mxu1  ;;  %v1230_v26 = vld [vmem:[%s3131_s12 + $0x10] sm:$0xff] }
 0x1fb   : > { %v1165_v34 = vmax.f32 %v1088_v29, 0.0  ;;  %v1092_v35 = vadd.f32 %v1091_v33, %v3072_v23 }
 0x1fc   : > { %1196 = vst [vmem:[%s3087_s19] sm:$0xff] %v1164_v31  ;;  %v1166_v37 = vmax.f32 %v3092_v32, 0.0 }
 0x1fd   : > { %1197 = vst [vmem:[%s3087_s19 + $0x8] sm:$0xff] %v1165_v34  ;;  %v1244_v39 = vmul.f32 0.5, %v1165_v34  ;;  %v1167_v40 = vmax.f32 %v1092_v35, 0.0 }
 0x1fe   : > { %1198 = vst [vmem:[%s3087_s19 + $0x10] sm:$0xff] %v1166_v37 }
 0x1ff   : > { %v1260_v41 = vmul.f32 1.442695, %v1244_v39  ;;  %1199 = vst [vmem:[%s3087_s19 + $0x18] sm:$0xff] %v1167_v40  ;;  %v1245_v42 = vmul.f32 0.5, %v1167_v40  ;;  %v1095_v43 = vpop.f32.mrb[4].mxu1  ;;  %v1231_v39 = vld [vmem:[%s3131_s12 + $0x18] sm:$0xff] }
 0x200   : > { %v3114_v45 = vadd.f32 %v1095_v43, %v3066_v21  ;;  %v1097_v46 = vpop.f32.mrb[5].mxu1 }
 0x201   : > { %2494 = vpow2.f32 %v1260_v41  ;;  %v1262_v47 = vmul.f32 1.442695, %v1245_v42  ;;  %v1098_v48 = vadd.f32 %v1097_v46, %v3072_v23  ;;  %v1099_v49 = vpop.f32.mrb[6].mxu1 }
 0x202   : > { %v1168_v50 = vmax.f32 %v3114_v45, 0.0  ;;  %v3119_v51 = vadd.f32 %v1099_v49, %v3066_v21  ;;  %v1101_v52 = vpop.f32.mrb[7].mxu1  ;;  %v1232_v45 = vld [vmem:[%s3131_s12 + $0x20] sm:$0xff] }
 0x203   : > { %2496 = vpow2.f32 %v1262_v47  ;;  %v1169_v53 = vmax.f32 %v1098_v48, 0.0  ;;  %v1102_v63 = vadd.f32 %v1101_v52, %v3072_v23 }
 0x204   : > { %1200 = vst [vmem:[%s3087_s19 + $0x20] sm:$0xff] %v1168_v50  ;;  %v1170_v0 = vmax.f32 %v3119_v51, 0.0 }
 0x205   : > { %1201 = vst [vmem:[%s3087_s19 + $0x28] sm:$0xff] %v1169_v53  ;;  %v1246_v54 = vmul.f32 0.5, %v1169_v53  ;;  %v1171_v55 = vmax.f32 %v1102_v63, 0.0 }
 0x206   : > { %1202 = vst [vmem:[%s3087_s19 + $0x30] sm:$0xff] %v1170_v0 }
 0x207   : > { %v1264_v56 = vmul.f32 1.442695, %v1246_v54  ;;  %1203 = vst [vmem:[%s3087_s19 + $0x38] sm:$0xff] %v1171_v55  ;;  %v1247_v58 = vmul.f32 0.5, %v1171_v55  ;;  %v1105_v59 = vpop.f32.mrb[8].mxu1 }
 0x208   : > { %v3138_v61 = vadd.f32 %v1105_v59, %v3066_v21  ;;  %v1107_v1 = vpop.f32.mrb[9].mxu1 }
 0x209   : > { %2498 = vpow2.f32 %v1264_v56  ;;  %v1266_v3 = vmul.f32 1.442695, %v1247_v58  ;;  %v1108_v4 = vadd.f32 %v1107_v1, %v3072_v23  ;;  %v1109_v5 = vpop.f32.mrb[10].mxu1 }
 0x20a   : > { %v1172_v6 = vmax.f32 %v3138_v61, 0.0  ;;  %v3144_v7 = vadd.f32 %v1109_v5, %v3066_v21  ;;  %v1111_v8 = vpop.f32.mrb[11].mxu1  ;;  %v1234_v61 = vld [vmem:[%s3131_s12 + $0x30] sm:$0xff] }
 0x20b   : > { %v2495_v9 = vpop.eup %2494  ;;  %2500 = vpow2.f32 %v1266_v3  ;;  %v1173_v11 = vmax.f32 %v1108_v4, 0.0  ;;  %v1112_v12 = vadd.f32 %v1111_v8, %v3072_v23  ;;  %v1233_v4 = vld [vmem:[%s3131_s12 + $0x28] sm:$0xff] }
 0x20c   : > { %v1292_v13 = vmul.f32 %v2495_v9, %v1228_v2  ;;  %1204 = vst [vmem:[%s3087_s19 + $0x40] sm:$0xff] %v1172_v6  ;;  %v1174_v14 = vmax.f32 %v3144_v7, 0.0 }
 0x20d   : > { %v2497_v15 = vpop.eup %2496  ;;  %1205 = vst [vmem:[%s3087_s19 + $0x48] sm:$0xff] %v1173_v11  ;;  %v1248_v16 = vmul.f32 0.5, %v1173_v11  ;;  %v1175_v17 = vmax.f32 %v1112_v12, 0.0 }
 0x20e   : > { %v1293_v18 = vmul.f32 %v2497_v15, %v1229_v10  ;;  %1206 = vst [vmem:[%s3087_s19 + $0x50] sm:$0xff] %v1174_v14  ;;  %v1308_v19 = vadd.f32 %v1292_v13, %v1164_v31 }
 0x20f   : > { %v1268_v20 = vmul.f32 1.442695, %v1248_v16  ;;  %1207 = vst [vmem:[%s3087_s19 + $0x58] sm:$0xff] %v1175_v17  ;;  %v1249_v22 = vmul.f32 0.5, %v1175_v17  ;;  %v1115_v24 = vpop.f32.mrb[12].mxu1 }
 0x210   : > { %v3160_v25 = vadd.f32 %v1115_v24, %v3066_v21  ;;  %v1117_v27 = vpop.f32.mrb[13].mxu1  ;;  %v1309_v28 = vadd.f32 %v1293_v18, %v1166_v37 }
 0x211   : > { %2502 = vpow2.f32 %v1268_v20  ;;  %v1270_v29 = vmul.f32 1.442695, %v1249_v22  ;;  %v1118_v30 = vadd.f32 %v1117_v27, %v3072_v23  ;;  %v1119_v33 = vpop.f32.mrb[14].mxu1 }
 0x212   : > { %v1176_v31 = vmax.f32 %v3160_v25, 0.0  ;;  %v3168_v34 = vadd.f32 %v1119_v33, %v3066_v21  ;;  %v1121_v35 = vpop.f32.mrb[15].mxu1  ;;  %v1324_v36 = vpack.c.bf16 %v1309_v28, %v1308_v19  ;;  %v1236_v25 = vld [vmem:[%s3131_s12 + $0x40] sm:$0xff] }
 0x213   : > { %v2499_v38 = vpop.eup %2498  ;;  %2504 = vpow2.f32 %v1270_v29  ;;  %v1177_v32 = vmax.f32 %v1118_v30, 0.0  ;;  %v1122_v37 = vadd.f32 %v1121_v35, %v3072_v23 }
 0x214   : > { %1208 = vst [vmem:[%s3087_s19 + $0x60] sm:$0xff] %v1176_v31  ;;  %v1178_v40 = vmax.f32 %v3168_v34, 0.0  ;;  %1473 = vmatmul.mubr.bf16.vlgmr.msra.gmra.mrb[32].mxu0 %v1324_v36  ;;  %v1294_v41 = vmul.f32 %v2499_v38, %v1230_v26  ;;  %v1235_v26 = vld [vmem:[%s3131_s12 + $0x38] sm:$0xff] }
 0x215   : > { %v2501_v42 = vpop.eup %2500  ;;  %1209 = vst [vmem:[%s3087_s19 + $0x68] sm:$0xff] %v1177_v32  ;;  %v1250_v43 = vmul.f32 0.5, %v1177_v32  ;;  %v1179_v44 = vmax.f32 %v1122_v37, 0.0  ;;  %1482 = vmatprep.mubr.bf16.mxu0 %v2598_v57 }
 0x216   : > { %1210 = vst [vmem:[%s3087_s19 + $0x70] sm:$0xff] %v1178_v40  ;;  %v1295_v46 = vmul.f32 %v2501_v42, %v1231_v39  ;;  %v1310_v47 = vadd.f32 %v1294_v41, %v1168_v50 }
 0x217   : > { %v1272_v48 = vmul.f32 1.442695, %v1250_v43  ;;  %1211 = vst [vmem:[%s3087_s19 + $0x78] sm:$0xff] %v1179_v44  ;;  %v1251_v49 = vmul.f32 0.5, %v1179_v44  ;;  %v1125_v52 = vpop.f32.mrb[16].mxu1 }
 0x218   : > { %v3185_v53 = vadd.f32 %v1125_v52, %v3066_v21  ;;  %v1127_v63 = vpop.f32.mrb[17].mxu1  ;;  %v1311_v54 = vadd.f32 %v1295_v46, %v1170_v0 }
 0x219   : > { %2506 = vpow2.f32 %v1272_v48  ;;  %v1274_v55 = vmul.f32 1.442695, %v1251_v49  ;;  %v1128_v56 = vadd.f32 %v1127_v63, %v3072_v23  ;;  %v1129_v58 = vpop.f32.mrb[18].mxu1 }
 0x21a   : > { %v1180_v50 = vmax.f32 %v3185_v53, 0.0  ;;  %v3193_v59 = vadd.f32 %v1129_v58, %v3066_v21  ;;  %v1131_v1 = vpop.f32.mrb[19].mxu1  ;;  %v1325_v2 = vpack.c.bf16 %v1311_v54, %v1310_v47  ;;  %v1238_v53 = vld [vmem:[%s3131_s12 + $0x50] sm:$0xff] }
 0x21b   : > { %v2503_v3 = vpop.eup %2502  ;;  %2508 = vpow2.f32 %v1274_v55  ;;  %v1181_v51 = vmax.f32 %v1128_v56, 0.0  ;;  %v1132_v0 = vadd.f32 %v1131_v1, %v3072_v23 }
 0x21c   : > { %1212 = vst [vmem:[%s3087_s19 + $0x80] sm:$0xff] %v1180_v50  ;;  %v1182_v5 = vmax.f32 %v3193_v59, 0.0  ;;  %1483 = vmatmul.mubr.bf16.gmra.mrb[36].mxu0 %v1325_v2  ;;  %v1296_v8 = vmul.f32 %v2503_v3, %v1232_v45  ;;  %v1237_v45 = vld [vmem:[%s3131_s12 + $0x48] sm:$0xff] }
 0x21d   : > { %v2505_v9 = vpop.eup %2504  ;;  %1213 = vst [vmem:[%s3087_s19 + $0x88] sm:$0xff] %v1181_v51  ;;  %v1252_v10 = vmul.f32 0.5, %v1181_v51  ;;  %v1183_v11 = vmax.f32 %v1132_v0, 0.0  ;;  %1492 = vmatprep.mubr.bf16.mxu0 %v2598_v57 }
 0x21e   : > { %1214 = vst [vmem:[%s3087_s19 + $0x90] sm:$0xff] %v1182_v5  ;;  %v1297_v12 = vmul.f32 %v2505_v9, %v1233_v4  ;;  %v1312_v13 = vadd.f32 %v1296_v8, %v1172_v6 }
 0x21f   : > { %v1276_v15 = vmul.f32 1.442695, %v1252_v10  ;;  %1215 = vst [vmem:[%s3087_s19 + $0x98] sm:$0xff] %v1183_v11  ;;  %v1253_v16 = vmul.f32 0.5, %v1183_v11  ;;  %v1135_v17 = vpop.f32.mrb[20].mxu1 }
 0x220   : > { %v3210_v18 = vadd.f32 %v1135_v17, %v3066_v21  ;;  %v1137_v19 = vpop.f32.mrb[21].mxu1  ;;  %v1313_v20 = vadd.f32 %v1297_v12, %v1174_v14 }
 0x221   : > { %2510 = vpow2.f32 %v1276_v15  ;;  %v1278_v22 = vmul.f32 1.442695, %v1253_v16  ;;  %v1138_v24 = vadd.f32 %v1137_v19, %v3072_v23  ;;  %v1139_v27 = vpop.f32.mrb[22].mxu1 }
 0x222   : > { %v1184_v6 = vmax.f32 %v3210_v18, 0.0  ;;  %v3218_v28 = vadd.f32 %v1139_v27, %v3066_v21  ;;  %v1141_v29 = vpop.f32.mrb[23].mxu1  ;;  %v1326_v30 = vpack.c.bf16 %v1313_v20, %v1312_v13 }
 0x223   : > { %v2507_v33 = vpop.eup %2506  ;;  %2512 = vpow2.f32 %v1278_v22  ;;  %v1185_v7 = vmax.f32 %v1138_v24, 0.0  ;;  %v1142_v14 = vadd.f32 %v1141_v29, %v3072_v23 }
 0x224   : > { %1216 = vst [vmem:[%s3087_s19 + $0xa0] sm:$0xff] %v1184_v6  ;;  %v1186_v35 = vmax.f32 %v3218_v28, 0.0  ;;  %1493 = vmatmul.mubr.bf16.gmra.mrb[40].mxu0 %v1326_v30  ;;  %v1298_v36 = vmul.f32 %v2507_v33, %v1234_v61 }
 0x225   : > { %v2509_v38 = vpop.eup %2508  ;;  %1217 = vst [vmem:[%s3087_s19 + $0xa8] sm:$0xff] %v1185_v7  ;;  %v1254_v32 = vmul.f32 0.5, %v1185_v7  ;;  %v1187_v37 = vmax.f32 %v1142_v14, 0.0  ;;  %1502 = vmatprep.mubr.bf16.mxu0 %v2598_v57 }
 0x226   : > { %1218 = vst [vmem:[%s3087_s19 + $0xb0] sm:$0xff] %v1186_v35  ;;  %v1299_v39 = vmul.f32 %v2509_v38, %v1235_v26  ;;  %v1314_v41 = vadd.f32 %v1298_v36, %v1176_v31 }
 0x227   : > { %v1280_v42 = vmul.f32 1.442695, %v1254_v32  ;;  %1219 = vst [vmem:[%s3087_s19 + $0xb8] sm:$0xff] %v1187_v37  ;;  %v1255_v43 = vmul.f32 0.5, %v1187_v37  ;;  %v1145_v44 = vpop.f32.mrb[24].mxu1  ;;  %v1240_v37 = vld [vmem:[%s3131_s12 + $0x60] sm:$0xff] }
 0x228   : > { %v3235_v46 = vadd.f32 %v1145_v44, %v3066_v21  ;;  %v1147_v47 = vpop.f32.mrb[25].mxu1  ;;  %v1315_v48 = vadd.f32 %v1299_v39, %v1178_v40 }
 0x229   : > { %2514 = vpow2.f32 %v1280_v42  ;;  %v1282_v49 = vmul.f32 1.442695, %v1255_v43  ;;  %v1148_v52 = vadd.f32 %v1147_v47, %v3072_v23  ;;  %v1149_v63 = vpop.f32.mrb[26].mxu1  ;;  %v1241_v42 = vld [vmem:[%s3131_s12 + $0x68] sm:$0xff]  ;;  %v1242_v47 = vld [vmem:[%s3131_s12 + $0x70] sm:$0xff] }
 0x22a   : > { %v1188_v31 = vmax.f32 %v3235_v46, 0.0  ;;  %v3243_v54 = vadd.f32 %v1149_v63, %v3066_v21  ;;  %v1151_v55 = vpop.f32.mrb[27].mxu1  ;;  %v1327_v56 = vpack.c.bf16 %v1315_v48, %v1314_v41  ;;  %v2490_v46 = vld [vmem:[%s3425_s8 + $0xe4] ss:$8 sps:$4 sm:$0xff]  }
 0x22b   : > { %v2511_v58 = vpop.eup %2510  ;;  %2516 = vpow2.f32 %v1282_v49  ;;  %v1189_v34 = vmax.f32 %v1148_v52, 0.0  ;;  %v1152_v40 = vadd.f32 %v1151_v55, %v3072_v23  ;;  %v1243_v49 = vld [vmem:[%s3131_s12 + $0x78] sm:$0xff]  ;;  %1833 = vmatprep.subr.bf16.mxu1 %v2490_v46 }
 0x22c   : > { %1220 = vst [vmem:[%s3087_s19 + $0xc0] sm:$0xff] %v1188_v31  ;;  %v1190_v1 = vmax.f32 %v3243_v54, 0.0  ;;  %1503 = vmatmul.mubr.bf16.gmra.mrb[44].mxu0 %v1327_v56  ;;  %v1300_v2 = vmul.f32 %v2511_v58, %v1236_v25  ;;  %v2493_v58 = vld [vmem:[%s3425_s8 + $0xf4] ss:$8 sps:$4 sm:$0xff]  }
 0x22d   : > { %v2513_v3 = vpop.eup %2512  ;;  %1221 = vst [vmem:[%s3087_s19 + $0xc8] sm:$0xff] %v1189_v34  ;;  %v1256_v51 = vmul.f32 0.5, %v1189_v34  ;;  %v1191_v0 = vmax.f32 %v1152_v40, 0.0  ;;  %1512 = vmatprep.mubr.bf16.mxu0 %v2598_v57  ;;  %v1348_v34 = vld [vmem:[%s3424_s7] sm:$0x3] }
 0x22e   : > { %1222 = vst [vmem:[%s3087_s19 + $0xd0] sm:$0xff] %v1190_v1  ;;  %v1301_v4 = vmul.f32 %v2513_v3, %v1237_v45  ;;  %v1316_v8 = vadd.f32 %v1300_v2, %v1180_v50  ;;  %v3298_v40 = vrot.slane %v1348_v34, %v2932_v60  ;;  %v3301_v45 = vrot.slane %v1348_v34, %v2937_v62 }
 0x22f   : > { %v1284_v9 = vmul.f32 1.442695, %v1256_v51  ;;  %1223 = vst [vmem:[%s3087_s19 + $0xd8] sm:$0xff] %v1191_v0  ;;  %v1257_v10 = vmul.f32 0.5, %v1191_v0  ;;  %v1155_v11 = vpop.f32.mrb[28].mxu1 }
 0x230   : > { %v1156_v12 = vadd.f32 %v1155_v11, %v3066_v21  ;;  %v1157_v13 = vpop.f32.mrb[29].mxu1  ;;  %v1317_v15 = vadd.f32 %v1301_v4, %v1182_v5  ;;  %v1239_v5 = vld [vmem:[%s3131_s12 + $0x58] sm:$0xff] }
 0x231   : > { %2518 = vpow2.f32 %v1284_v9  ;;  %v1286_v16 = vmul.f32 1.442695, %v1257_v10  ;;  %v1158_v17 = vadd.f32 %v1157_v13, %v3072_v23  ;;  %v1159_v19 = vpop.f32.mrb[30].mxu1 }
 0x232   : > { %v1192_v50 = vmax.f32 %v1156_v12, 0.0  ;;  %v1160_v20 = vadd.f32 %v1159_v19, %v3066_v21  ;;  %v1161_v22 = vpop.f32.mrb[31].mxu1  ;;  %v1328_v24 = vpack.c.bf16 %v1317_v15, %v1316_v8 }
 0x233   : > { %v2515_v27 = vpop.eup %2514  ;;  %2520 = vpow2.f32 %v1286_v16  ;;  %v1193_v61 = vmax.f32 %v1158_v17, 0.0  ;;  %v1162_v59 = vadd.f32 %v1161_v22, %v3072_v23 }
 0x234   : > { %1224 = vst [vmem:[%s3087_s19 + $0xe0] sm:$0xff] %v1192_v50  ;;  %v1194_v29 = vmax.f32 %v1160_v20, 0.0  ;;  %1513 = vmatmul.mubr.bf16.gmra.mrb[48].mxu0 %v1328_v24  ;;  %v1302_v30 = vmul.f32 %v2515_v27, %v1238_v53 }
 0x235   : > { %v2517_v33 = vpop.eup %2516  ;;  %1225 = vst [vmem:[%s3087_s19 + $0xe8] sm:$0xff] %v1193_v61  ;;  %v1258_v7 = vmul.f32 0.5, %v1193_v61  ;;  %v1195_v21 = vmax.f32 %v1162_v59, 0.0  ;;  %1522 = vmatprep.mubr.bf16.mxu0 %v2598_v57 }
 0x236   : > { %1226 = vst [vmem:[%s3087_s19 + $0xf0] sm:$0xff] %v1194_v29  ;;  %v1303_v14 = vmul.f32 %v2517_v33, %v1239_v5  ;;  %v1318_v26 = vadd.f32 %v1302_v30, %v1184_v6 }
 0x237   : > { %v1288_v36 = vmul.f32 1.442695, %v1258_v7  ;;  %1227 = vst [vmem:[%s3087_s19 + $0xf8] sm:$0xff] %v1195_v21  ;;  %v1259_v23 = vmul.f32 0.5, %v1195_v21 }
 0x238   : > { %v1319_v38 = vadd.f32 %v1303_v14, %v1186_v35 }
 0x239   : > { %2522 = vpow2.f32 %v1288_v36  ;;  %v1290_v32 = vmul.f32 1.442695, %v1259_v23 }
 0x23a   : > { %v1329_v39 = vpack.c.bf16 %v1319_v38, %v1318_v26 }
 0x23b   : > { %v2519_v41 = vpop.eup %2518  ;;  %2524 = vpow2.f32 %v1290_v32 }
 0x23c   : > { %1523 = vmatmul.mubr.bf16.gmra.mrb[52].mxu0 %v1329_v39  ;;  %v1304_v43 = vmul.f32 %v2519_v41, %v1240_v37 }
 0x23d   : > { %v2521_v44 = vpop.eup %2520  ;;  %1532 = vmatprep.mubr.bf16.mxu0 %v2598_v57 }
 0x23e   : > { %v1305_v18 = vmul.f32 %v2521_v44, %v1241_v42  ;;  %v1320_v6 = vadd.f32 %v1304_v43, %v1188_v31  ;;  %v2488_v31 = vld [vmem:[%s3425_s8 + $0xe0] ss:$8 sps:$4 sm:$0xff]  }
 0x23f   : > { %1834 = vmatpush1.bf16.msra.mxu1 %v2488_v31 }
 0x240   : > { %v1321_v28 = vadd.f32 %v1305_v18, %v1190_v1  ;;  %1835 = vmatprep.subr.bf16.mxu1 %v2493_v58 }
 0x242   : > { %v1330_v35 = vpack.c.bf16 %v1321_v28, %v1320_v6 }
 0x243   : > { %v2523_v48 = vpop.eup %2522 }
 0x244   : > { %1533 = vmatmul.mubr.bf16.gmra.mrb[56].mxu0 %v1330_v35  ;;  %v1306_v52 = vmul.f32 %v2523_v48, %v1242_v47 }
 0x245   : > { %v2525_v63 = vpop.eup %2524  ;;  %1542 = vmatprep.mubr.bf16.mxu0 %v2598_v57  ;;  %v2491_v57 = vld [vmem:[%s3425_s8 + $0xf0] ss:$8 sps:$4 sm:$0xff]  }
 0x246   : > { %v1307_v25 = vmul.f32 %v2525_v63, %v1243_v49  ;;  %v1322_v54 = vadd.f32 %v1306_v52, %v1192_v50  ;;  %1836 = vmatpush1.bf16.msra.mxu1 %v2491_v57 }
 0x248   : > { %v1323_v55 = vadd.f32 %v1307_v25, %v1194_v29 }
 0x24a   : > { %v1331_v56 = vpack.c.bf16 %v1323_v55, %v1322_v54 }
 0x24c   : > { %1543 = vmatmul.mubr.bf16.gmra.mrb[60].mxu0 %v1331_v56 }
 0x2e7   : > { %v1474_v1 = vpop.f32.mrb[32].mxu0 }
 0x2e8   : > { %v1475_v2 = vadd.f32 %v1474_v1, %v3298_v40  ;;  %v1476_v3 = vpop.f32.mrb[33].mxu0 }
 0x2e9   : > { %v1477_v51 = vadd.f32 %v1476_v3, %v3301_v45  ;;  %v1478_v0 = vpop.f32.mrb[34].mxu0 }
 0x2ea   : > { %v1479_v4 = vadd.f32 %v1478_v0, %v3298_v40  ;;  %v1480_v8 = vpop.f32.mrb[35].mxu0  ;;  %v1553_v10 = vmax.f32 %v1475_v2, 0.0 }
 0x2eb   : > { %v1481_v9 = vadd.f32 %v1480_v8, %v3301_v45  ;;  %v1554_v12 = vmax.f32 %v1477_v51, 0.0 }
 0x2ec   : > { %v1555_v11 = vmax.f32 %v1479_v4, 0.0 }
 0x2ed   : > { %v1556_v13 = vmax.f32 %v1481_v9, 0.0 }
 0x2ee   : > { %v1585_v15 = vpack.c.bf16 %v1555_v11, %v1553_v10 }
 0x2ef   : > { %v1586_v16 = vpack.c.bf16 %v1556_v13, %v1554_v12  ;;  %v1484_v17 = vpop.f32.mrb[36].mxu0 }
 0x2f0   : > { %v1485_v19 = vadd.f32 %v1484_v17, %v3298_v40  ;;  %v1486_v53 = vpop.f32.mrb[37].mxu0 }
 0x2f1   : > { %v1487_v50 = vadd.f32 %v1486_v53, %v3301_v45  ;;  %v1488_v20 = vpop.f32.mrb[38].mxu0  ;;  %1837 = vmatprep.mubr.bf16.mxu1 %v1586_v16 }
 0x2f2   : > { %v1489_v22 = vadd.f32 %v1488_v20, %v3298_v40  ;;  %v1490_v24 = vpop.f32.mrb[39].mxu0  ;;  %1838 = vmatmul.mubr.bf16.vlgmr.msra.gmra.mrb[32].mxu1 %v1585_v15  ;;  %v1557_v61 = vmax.f32 %v1485_v19, 0.0 }
 0x2f3   : > { %v1491_v27 = vadd.f32 %v1490_v24, %v3301_v45  ;;  %v1558_v5 = vmax.f32 %v1487_v50, 0.0 }
 0x2f4   : > { %v1559_v59 = vmax.f32 %v1489_v22, 0.0 }
 0x2f5   : > { %v1560_v29 = vmax.f32 %v1491_v27, 0.0 }
 0x2f6   : > { %v1587_v30 = vpack.c.bf16 %v1559_v59, %v1557_v61 }
 0x2f7   : > { %v1588_v33 = vpack.c.bf16 %v1560_v29, %v1558_v5  ;;  %v1494_v7 = vpop.f32.mrb[40].mxu0 }
 0x2f8   : > { %v1495_v21 = vadd.f32 %v1494_v7, %v3298_v40  ;;  %v1496_v14 = vpop.f32.mrb[41].mxu0 }
 0x2f9   : > { %v1497_v26 = vadd.f32 %v1496_v14, %v3301_v45  ;;  %v1498_v36 = vpop.f32.mrb[42].mxu0  ;;  %1847 = vmatprep.mubr.bf16.mxu1 %v1588_v33 }
 0x2fa   : > { %v1499_v23 = vadd.f32 %v1498_v36, %v3298_v40  ;;  %v1500_v38 = vpop.f32.mrb[43].mxu0  ;;  %1848 = vmatmul.mubr.bf16.gmra.mrb[36].mxu1 %v1587_v30  ;;  %v1561_v37 = vmax.f32 %v1495_v21, 0.0 }
 0x2fb   : > { %v1501_v32 = vadd.f32 %v1500_v38, %v3301_v45  ;;  %v1562_v41 = vmax.f32 %v1497_v26, 0.0 }
 0x2fc   : > { %v1563_v39 = vmax.f32 %v1499_v23, 0.0 }
 0x2fd   : > { %v1564_v42 = vmax.f32 %v1501_v32, 0.0 }
 0x2fe   : > { %v1589_v43 = vpack.c.bf16 %v1563_v39, %v1561_v37 }
 0x2ff   : > { %v1590_v44 = vpack.c.bf16 %v1564_v42, %v1562_v41  ;;  %v1504_v18 = vpop.f32.mrb[44].mxu0 }
 0x300   : > { %v1505_v6 = vadd.f32 %v1504_v18, %v3298_v40  ;;  %v1506_v28 = vpop.f32.mrb[45].mxu0 }
 0x301   : > { %v1507_v47 = vadd.f32 %v1506_v28, %v3301_v45  ;;  %v1508_v35 = vpop.f32.mrb[46].mxu0  ;;  %1857 = vmatprep.mubr.bf16.mxu1 %v1590_v44 }
 0x302   : > { %v1509_v48 = vadd.f32 %v1508_v35, %v3298_v40  ;;  %v1510_v49 = vpop.f32.mrb[47].mxu0  ;;  %1858 = vmatmul.mubr.bf16.gmra.mrb[40].mxu1 %v1589_v43  ;;  %v1565_v63 = vmax.f32 %v1505_v6, 0.0 }
 0x303   : > { %v1511_v52 = vadd.f32 %v1510_v49, %v3301_v45  ;;  %v1566_v54 = vmax.f32 %v1507_v47, 0.0 }
 0x304   : > { %v1567_v25 = vmax.f32 %v1509_v48, 0.0 }
 0x305   : > { %v1568_v55 = vmax.f32 %v1511_v52, 0.0 }
 0x306   : > { %v1591_v56 = vpack.c.bf16 %v1567_v25, %v1565_v63 }
 0x307   : > { %v1592_v46 = vpack.c.bf16 %v1568_v55, %v1566_v54  ;;  %v1514_v31 = vpop.f32.mrb[48].mxu0  ;;  %v1633_v54 = vld [vmem:[%s3426_s9] sm:$0x3] }
 0x308   : > { %v1515_v58 = vadd.f32 %v1514_v31, %v3298_v40  ;;  %v1516_v57 = vpop.f32.mrb[49].mxu0  ;;  %v3339_v55 = vrot.slane %v1633_v54, %v2932_v60 }
 0x309   : > { %v1517_v34 = vadd.f32 %v1516_v57, %v3301_v45  ;;  %v1518_v1 = vpop.f32.mrb[50].mxu0  ;;  %1867 = vmatprep.mubr.bf16.mxu1 %v1592_v46 }
 0x30a   : > { %v1519_v2 = vadd.f32 %v1518_v1, %v3298_v40  ;;  %v1520_v3 = vpop.f32.mrb[51].mxu0  ;;  %1868 = vmatmul.mubr.bf16.gmra.mrb[44].mxu1 %v1591_v56  ;;  %v1569_v0 = vmax.f32 %v1515_v58, 0.0 }
 0x30b   : > { %v1521_v51 = vadd.f32 %v1520_v3, %v3301_v45  ;;  %v1570_v8 = vmax.f32 %v1517_v34, 0.0 }
 0x30c   : > { %v1571_v4 = vmax.f32 %v1519_v2, 0.0 }
 0x30d   : > { %v1572_v9 = vmax.f32 %v1521_v51, 0.0 }
 0x30e   : > { %v1593_v10 = vpack.c.bf16 %v1571_v4, %v1569_v0 }
 0x30f   : > { %v1594_v11 = vpack.c.bf16 %v1572_v9, %v1570_v8  ;;  %v1524_v12 = vpop.f32.mrb[52].mxu0 }
 0x310   : > { %v1525_v13 = vadd.f32 %v1524_v12, %v3298_v40  ;;  %v1526_v15 = vpop.f32.mrb[53].mxu0 }
 0x311   : > { %v1527_v16 = vadd.f32 %v1526_v15, %v3301_v45  ;;  %v1528_v17 = vpop.f32.mrb[54].mxu0  ;;  %1877 = vmatprep.mubr.bf16.mxu1 %v1594_v11 }
 0x312   : > { %v1529_v19 = vadd.f32 %v1528_v17, %v3298_v40  ;;  %v1530_v53 = vpop.f32.mrb[55].mxu0  ;;  %1878 = vmatmul.mubr.bf16.gmra.mrb[48].mxu1 %v1593_v10  ;;  %v1573_v20 = vmax.f32 %v1525_v13, 0.0 }
 0x313   : > { %v1531_v50 = vadd.f32 %v1530_v53, %v3301_v45  ;;  %v1574_v24 = vmax.f32 %v1527_v16, 0.0 }
 0x314   : > { %v1575_v22 = vmax.f32 %v1529_v19, 0.0 }
 0x315   : > { %v1576_v27 = vmax.f32 %v1531_v50, 0.0 }
 0x316   : > { %v1595_v61 = vpack.c.bf16 %v1575_v22, %v1573_v20 }
 0x317   : > { %v1596_v59 = vpack.c.bf16 %v1576_v27, %v1574_v24  ;;  %v1534_v5 = vpop.f32.mrb[56].mxu0 }
 0x318   : > { %v1535_v29 = vadd.f32 %v1534_v5, %v3298_v40  ;;  %v1536_v30 = vpop.f32.mrb[57].mxu0 }
 0x319   : > { %v1537_v33 = vadd.f32 %v1536_v30, %v3301_v45  ;;  %v1538_v7 = vpop.f32.mrb[58].mxu0  ;;  %1887 = vmatprep.mubr.bf16.mxu1 %v1596_v59 }
 0x31a   : > { %v1539_v21 = vadd.f32 %v1538_v7, %v3298_v40  ;;  %v1540_v14 = vpop.f32.mrb[59].mxu0  ;;  %1888 = vmatmul.mubr.bf16.gmra.mrb[52].mxu1 %v1595_v61  ;;  %v1577_v36 = vmax.f32 %v1535_v29, 0.0 }
 0x31b   : > { %v1541_v26 = vadd.f32 %v1540_v14, %v3301_v45  ;;  %v1578_v38 = vmax.f32 %v1537_v33, 0.0 }
 0x31c   : > { %v1579_v23 = vmax.f32 %v1539_v21, 0.0 }
 0x31d   : > { %v1580_v32 = vmax.f32 %v1541_v26, 0.0 }
 0x31e   : > { %v1597_v37 = vpack.c.bf16 %v1579_v23, %v1577_v36 }
 0x31f   : > { %v1598_v39 = vpack.c.bf16 %v1580_v32, %v1578_v38  ;;  %v1544_v41 = vpop.f32.mrb[60].mxu0 }
 0x320   : > { %v1545_v42 = vadd.f32 %v1544_v41, %v3298_v40  ;;  %v1546_v43 = vpop.f32.mrb[61].mxu0 }
 0x321   : > { %v1547_v44 = vadd.f32 %v1546_v43, %v3301_v45  ;;  %v1548_v18 = vpop.f32.mrb[62].mxu0  ;;  %1897 = vmatprep.mubr.bf16.mxu1 %v1598_v39 }
 0x322   : > { %v1549_v6 = vadd.f32 %v1548_v18, %v3298_v40  ;;  %v1550_v28 = vpop.f32.mrb[63].mxu0  ;;  %1898 = vmatmul.mubr.bf16.gmra.mrb[56].mxu1 %v1597_v37  ;;  %v1581_v35 = vmax.f32 %v1545_v42, 0.0  ;;  %v3342_v40 = vrot.slane %v1633_v54, %v2937_v62 }
 0x323   : > { %v1551_v47 = vadd.f32 %v1550_v28, %v3301_v45  ;;  %v1582_v49 = vmax.f32 %v1547_v44, 0.0 }
 0x324   : > { %v1583_v48 = vmax.f32 %v1549_v6, 0.0 }
 0x325   : > { %v1584_v52 = vmax.f32 %v1551_v47, 0.0 }
 0x326   : > { %v1599_v63 = vpack.c.bf16 %v1583_v48, %v1581_v35 }
 0x327   : > { %v1600_v25 = vpack.c.bf16 %v1584_v52, %v1582_v49 }
 0x329   : > { %1907 = vmatprep.mubr.bf16.mxu1 %v1600_v25 }
 0x32a   : > { %1908 = vmatmul.mubr.bf16.gmra.mrb[60].mxu1 %v1599_v63 }
 0x3c5   : > { %v1839_v56 = vpop.f32.mrb[32].mxu1 }
 0x3c6   : > { %v1840_v45 = vadd.f32 %v1839_v56, %v3339_v55  ;;  %v1841_v46 = vpop.f32.mrb[33].mxu1 }
 0x3c7   : > { %v1842_v31 = vadd.f32 %v1841_v46, %v3342_v40  ;;  %v1843_v58 = vpop.f32.mrb[34].mxu1 }
 0x3c8   : > { %v1918_v57 = vmul.f32 0.5, %v1840_v45  ;;  %v1844_v34 = vadd.f32 %v1843_v58, %v3339_v55  ;;  %v1845_v1 = vpop.f32.mrb[35].mxu1 }
 0x3c9   : > { %v1919_v2 = vmul.f32 0.5, %v1842_v31  ;;  %v1846_v3 = vadd.f32 %v1845_v1, %v3342_v40 }
 0x3ca   : > { %2526 = vtanh.f32 %v1918_v57  ;;  %v1920_v60 = vmul.f32 0.5, %v1844_v34 }
 0x3cb   : > { %2528 = vtanh.f32 %v1919_v2  ;;  %v1921_v51 = vmul.f32 0.5, %v1846_v3 }
 0x3cc   : > { %2530 = vtanh.f32 %v1920_v60 }
 0x3cd   : > { %2532 = vtanh.f32 %v1921_v51  ;;  %v1849_v62 = vpop.f32.mrb[36].mxu1 }
 0x3ce   : > { %v1850_v0 = vadd.f32 %v1849_v62, %v3339_v55  ;;  %v1851_v4 = vpop.f32.mrb[37].mxu1 }
 0x3cf   : > { %v1852_v8 = vadd.f32 %v1851_v4, %v3342_v40  ;;  %v1853_v9 = vpop.f32.mrb[38].mxu1 }
 0x3d0   : > { %v1922_v10 = vmul.f32 0.5, %v1850_v0  ;;  %v1854_v11 = vadd.f32 %v1853_v9, %v3339_v55  ;;  %v1855_v12 = vpop.f32.mrb[39].mxu1 }
 0x3d1   : > { %v1923_v13 = vmul.f32 0.5, %v1852_v8  ;;  %v1856_v15 = vadd.f32 %v1855_v12, %v3342_v40 }
 0x3d2   : > { %2534 = vtanh.f32 %v1922_v10  ;;  %v1924_v16 = vmul.f32 0.5, %v1854_v11 }
 0x3d3   : > { %2536 = vtanh.f32 %v1923_v13  ;;  %v1925_v17 = vmul.f32 0.5, %v1856_v15 }
 0x3d4   : > { %v2527_v19 = vpop.eup %2526  ;;  %2538 = vtanh.f32 %v1924_v16 }
 0x3d5   : > { %v2529_v53 = vpop.eup %2528  ;;  %v1982_v50 = vmul.f32 0.5, %v2527_v19  ;;  %2540 = vtanh.f32 %v1925_v17  ;;  %v1859_v20 = vpop.f32.mrb[40].mxu1 }
 0x3d6   : > { %v2531_v22 = vpop.eup %2530  ;;  %v1983_v24 = vmul.f32 0.5, %v2529_v53  ;;  %v1860_v27 = vadd.f32 %v1859_v20, %v3339_v55  ;;  %v1861_v61 = vpop.f32.mrb[41].mxu1 }
 0x3d7   : > { %v2533_v59 = vpop.eup %2532  ;;  %v2014_v5 = vadd.f32 0.5, %v1982_v50  ;;  %v1984_v29 = vmul.f32 0.5, %v2531_v22  ;;  %v1862_v30 = vadd.f32 %v1861_v61, %v3342_v40  ;;  %v1863_v33 = vpop.f32.mrb[42].mxu1 }
 0x3d8   : > { %v2015_v7 = vadd.f32 0.5, %v1983_v24  ;;  %v1985_v21 = vmul.f32 0.5, %v2533_v59  ;;  %v1926_v14 = vmul.f32 0.5, %v1860_v27  ;;  %v1864_v26 = vadd.f32 %v1863_v33, %v3339_v55  ;;  %v1865_v36 = vpop.f32.mrb[43].mxu1 }
 0x3d9   : > { %2046 = vst [vmem:[%s3356_s28] sm:$0xff] %v2014_v5  ;;  %v2016_v23 = vadd.f32 0.5, %v1984_v29  ;;  %v1927_v38 = vmul.f32 0.5, %v1862_v30  ;;  %v1866_v32 = vadd.f32 %v1865_v36, %v3342_v40 }
 0x3da   : > { %2047 = vst [vmem:[%s3356_s28 + $0x8] sm:$0xff] %v2015_v7  ;;  %v2017_v37 = vadd.f32 0.5, %v1985_v21  ;;  %2542 = vtanh.f32 %v1926_v14  ;;  %v1928_v39 = vmul.f32 0.5, %v1864_v26 }
 0x3db   : > { %2048 = vst [vmem:[%s3356_s28 + $0x10] sm:$0xff] %v2016_v23  ;;  %2544 = vtanh.f32 %v1927_v38  ;;  %v1929_v41 = vmul.f32 0.5, %v1866_v32 }
 0x3dc   : > { %v2535_v42 = vpop.eup %2534  ;;  %2049 = vst [vmem:[%s3356_s28 + $0x18] sm:$0xff] %v2017_v37  ;;  %2546 = vtanh.f32 %v1928_v39 }
 0x3dd   : > { %v2537_v43 = vpop.eup %2536  ;;  %v1986_v44 = vmul.f32 0.5, %v2535_v42  ;;  %2548 = vtanh.f32 %v1929_v41  ;;  %v1869_v18 = vpop.f32.mrb[44].mxu1 }
 0x3de   : > { %v2539_v6 = vpop.eup %2538  ;;  %v1987_v28 = vmul.f32 0.5, %v2537_v43  ;;  %v1870_v47 = vadd.f32 %v1869_v18, %v3339_v55  ;;  %v1871_v35 = vpop.f32.mrb[45].mxu1 }
 0x3df   : > { %v2541_v48 = vpop.eup %2540  ;;  %v2018_v49 = vadd.f32 0.5, %v1986_v44  ;;  %v1988_v52 = vmul.f32 0.5, %v2539_v6  ;;  %v1872_v63 = vadd.f32 %v1871_v35, %v3342_v40  ;;  %v1873_v25 = vpop.f32.mrb[46].mxu1 }
 0x3e0   : > { %v2019_v54 = vadd.f32 0.5, %v1987_v28  ;;  %v1989_v56 = vmul.f32 0.5, %v2541_v48  ;;  %v1930_v45 = vmul.f32 0.5, %v1870_v47  ;;  %v1874_v46 = vadd.f32 %v1873_v25, %v3339_v55  ;;  %v1875_v31 = vpop.f32.mrb[47].mxu1 }
 0x3e1   : > { %2050 = vst [vmem:[%s3356_s28 + $0x20] sm:$0xff] %v2018_v49  ;;  %v2020_v58 = vadd.f32 0.5, %v1988_v52  ;;  %v1931_v57 = vmul.f32 0.5, %v1872_v63  ;;  %v1876_v34 = vadd.f32 %v1875_v31, %v3342_v40 }
 0x3e2   : > { %2051 = vst [vmem:[%s3356_s28 + $0x28] sm:$0xff] %v2019_v54  ;;  %v2021_v1 = vadd.f32 0.5, %v1989_v56  ;;  %2550 = vtanh.f32 %v1930_v45  ;;  %v1932_v2 = vmul.f32 0.5, %v1874_v46 }
 0x3e3   : > { %2052 = vst [vmem:[%s3356_s28 + $0x30] sm:$0xff] %v2020_v58  ;;  %2552 = vtanh.f32 %v1931_v57  ;;  %v1933_v3 = vmul.f32 0.5, %v1876_v34 }
 0x3e4   : > { %v2543_v60 = vpop.eup %2542  ;;  %2053 = vst [vmem:[%s3356_s28 + $0x38] sm:$0xff] %v2021_v1  ;;  %2554 = vtanh.f32 %v1932_v2 }
 0x3e5   : > { %v2545_v51 = vpop.eup %2544  ;;  %v1990_v62 = vmul.f32 0.5, %v2543_v60  ;;  %2556 = vtanh.f32 %v1933_v3  ;;  %v1879_v0 = vpop.f32.mrb[48].mxu1 }
 0x3e6   : > { %v2547_v4 = vpop.eup %2546  ;;  %v1991_v8 = vmul.f32 0.5, %v2545_v51  ;;  %v1880_v9 = vadd.f32 %v1879_v0, %v3339_v55  ;;  %v1881_v10 = vpop.f32.mrb[49].mxu1 }
 0x3e7   : > { %v2549_v11 = vpop.eup %2548  ;;  %v2022_v12 = vadd.f32 0.5, %v1990_v62  ;;  %v1992_v13 = vmul.f32 0.5, %v2547_v4  ;;  %v1882_v15 = vadd.f32 %v1881_v10, %v3342_v40  ;;  %v1883_v16 = vpop.f32.mrb[50].mxu1 }
 0x3e8   : > { %v2023_v17 = vadd.f32 0.5, %v1991_v8  ;;  %v1993_v19 = vmul.f32 0.5, %v2549_v11  ;;  %v1934_v53 = vmul.f32 0.5, %v1880_v9  ;;  %v1884_v50 = vadd.f32 %v1883_v16, %v3339_v55  ;;  %v1885_v20 = vpop.f32.mrb[51].mxu1 }
 0x3e9   : > { %2054 = vst [vmem:[%s3356_s28 + $0x40] sm:$0xff] %v2022_v12  ;;  %v2024_v22 = vadd.f32 0.5, %v1992_v13  ;;  %v1935_v24 = vmul.f32 0.5, %v1882_v15  ;;  %v1886_v27 = vadd.f32 %v1885_v20, %v3342_v40 }
 0x3ea   : > { %2055 = vst [vmem:[%s3356_s28 + $0x48] sm:$0xff] %v2023_v17  ;;  %v2025_v61 = vadd.f32 0.5, %v1993_v19  ;;  %2558 = vtanh.f32 %v1934_v53  ;;  %v1936_v59 = vmul.f32 0.5, %v1884_v50 }
 0x3eb   : > { %2056 = vst [vmem:[%s3356_s28 + $0x50] sm:$0xff] %v2024_v22  ;;  %2560 = vtanh.f32 %v1935_v24  ;;  %v1937_v5 = vmul.f32 0.5, %v1886_v27 }
 0x3ec   : > { %v2551_v29 = vpop.eup %2550  ;;  %2057 = vst [vmem:[%s3356_s28 + $0x58] sm:$0xff] %v2025_v61  ;;  %2562 = vtanh.f32 %v1936_v59 }
 0x3ed   : > { %v2553_v30 = vpop.eup %2552  ;;  %v1994_v33 = vmul.f32 0.5, %v2551_v29  ;;  %2564 = vtanh.f32 %v1937_v5  ;;  %v1889_v7 = vpop.f32.mrb[52].mxu1 }
 0x3ee   : > { %v2555_v21 = vpop.eup %2554  ;;  %v1995_v14 = vmul.f32 0.5, %v2553_v30  ;;  %v1890_v26 = vadd.f32 %v1889_v7, %v3339_v55  ;;  %v1891_v36 = vpop.f32.mrb[53].mxu1 }
 0x3ef   : > { %v2557_v23 = vpop.eup %2556  ;;  %v2026_v38 = vadd.f32 0.5, %v1994_v33  ;;  %v1996_v32 = vmul.f32 0.5, %v2555_v21  ;;  %v1892_v37 = vadd.f32 %v1891_v36, %v3342_v40  ;;  %v1893_v39 = vpop.f32.mrb[54].mxu1 }
 0x3f0   : > { %v2027_v41 = vadd.f32 0.5, %v1995_v14  ;;  %v1997_v42 = vmul.f32 0.5, %v2557_v23  ;;  %v1938_v43 = vmul.f32 0.5, %v1890_v26  ;;  %v1894_v44 = vadd.f32 %v1893_v39, %v3339_v55  ;;  %v1895_v18 = vpop.f32.mrb[55].mxu1 }
 0x3f1   : > { %2058 = vst [vmem:[%s3356_s28 + $0x60] sm:$0xff] %v2026_v38  ;;  %v2028_v6 = vadd.f32 0.5, %v1996_v32  ;;  %v1939_v28 = vmul.f32 0.5, %v1892_v37  ;;  %v1896_v47 = vadd.f32 %v1895_v18, %v3342_v40 }
 0x3f2   : > { %2059 = vst [vmem:[%s3356_s28 + $0x68] sm:$0xff] %v2027_v41  ;;  %v2029_v35 = vadd.f32 0.5, %v1997_v42  ;;  %2566 = vtanh.f32 %v1938_v43  ;;  %v1940_v48 = vmul.f32 0.5, %v1894_v44 }
 0x3f3   : > { %2060 = vst [vmem:[%s3356_s28 + $0x70] sm:$0xff] %v2028_v6  ;;  %2568 = vtanh.f32 %v1939_v28  ;;  %v1941_v49 = vmul.f32 0.5, %v1896_v47 }
 0x3f4   : > { %v2559_v52 = vpop.eup %2558  ;;  %2061 = vst [vmem:[%s3356_s28 + $0x78] sm:$0xff] %v2029_v35  ;;  %2570 = vtanh.f32 %v1940_v48 }
 0x3f5   : > { %v2561_v63 = vpop.eup %2560  ;;  %v1998_v25 = vmul.f32 0.5, %v2559_v52  ;;  %2572 = vtanh.f32 %v1941_v49  ;;  %v1899_v54 = vpop.f32.mrb[56].mxu1 }
 0x3f6   : > { %v2563_v56 = vpop.eup %2562  ;;  %v1999_v45 = vmul.f32 0.5, %v2561_v63  ;;  %v1900_v46 = vadd.f32 %v1899_v54, %v3339_v55  ;;  %v1901_v31 = vpop.f32.mrb[57].mxu1 }
 0x3f7   : > { %v2565_v58 = vpop.eup %2564  ;;  %v2030_v57 = vadd.f32 0.5, %v1998_v25  ;;  %v2000_v34 = vmul.f32 0.5, %v2563_v56  ;;  %v1902_v1 = vadd.f32 %v1901_v31, %v3342_v40  ;;  %v1903_v2 = vpop.f32.mrb[58].mxu1 }
 0x3f8   : > { %v2031_v3 = vadd.f32 0.5, %v1999_v45  ;;  %v2001_v60 = vmul.f32 0.5, %v2565_v58  ;;  %v1942_v51 = vmul.f32 0.5, %v1900_v46  ;;  %v1904_v62 = vadd.f32 %v1903_v2, %v3339_v55  ;;  %v1905_v0 = vpop.f32.mrb[59].mxu1 }
 0x3f9   : > { %2062 = vst [vmem:[%s3356_s28 + $0x80] sm:$0xff] %v2030_v57  ;;  %v2032_v4 = vadd.f32 0.5, %v2000_v34  ;;  %v1943_v8 = vmul.f32 0.5, %v1902_v1  ;;  %v1906_v9 = vadd.f32 %v1905_v0, %v3342_v40 }
 0x3fa   : > { %2063 = vst [vmem:[%s3356_s28 + $0x88] sm:$0xff] %v2031_v3  ;;  %v2033_v10 = vadd.f32 0.5, %v2001_v60  ;;  %2574 = vtanh.f32 %v1942_v51  ;;  %v1944_v11 = vmul.f32 0.5, %v1904_v62 }
 0x3fb   : > { %2064 = vst [vmem:[%s3356_s28 + $0x90] sm:$0xff] %v2032_v4  ;;  %2576 = vtanh.f32 %v1943_v8  ;;  %v1945_v12 = vmul.f32 0.5, %v1906_v9 }
 0x3fc   : > { %v2567_v13 = vpop.eup %2566  ;;  %2065 = vst [vmem:[%s3356_s28 + $0x98] sm:$0xff] %v2033_v10  ;;  %2578 = vtanh.f32 %v1944_v11 }
 0x3fd   : > { %v2569_v15 = vpop.eup %2568  ;;  %v2002_v16 = vmul.f32 0.5, %v2567_v13  ;;  %2580 = vtanh.f32 %v1945_v12  ;;  %v1909_v17 = vpop.f32.mrb[60].mxu1 }
 0x3fe   : > { %v2571_v19 = vpop.eup %2570  ;;  %v2003_v53 = vmul.f32 0.5, %v2569_v15  ;;  %v1910_v50 = vadd.f32 %v1909_v17, %v3339_v55  ;;  %v1911_v20 = vpop.f32.mrb[61].mxu1 }
 0x3ff   : > { %v2573_v22 = vpop.eup %2572  ;;  %v2034_v24 = vadd.f32 0.5, %v2002_v16  ;;  %v2004_v27 = vmul.f32 0.5, %v2571_v19  ;;  %v1912_v61 = vadd.f32 %v1911_v20, %v3342_v40  ;;  %v1913_v59 = vpop.f32.mrb[62].mxu1 }
 0x400   : > { %v2035_v5 = vadd.f32 0.5, %v2003_v53  ;;  %v2005_v29 = vmul.f32 0.5, %v2573_v22  ;;  %v1946_v30 = vmul.f32 0.5, %v1910_v50  ;;  %v1914_v33 = vadd.f32 %v1913_v59, %v3339_v55  ;;  %v1915_v7 = vpop.f32.mrb[63].mxu1 }
 0x401   : > { %2066 = vst [vmem:[%s3356_s28 + $0xa0] sm:$0xff] %v2034_v24  ;;  %v2036_v21 = vadd.f32 0.5, %v2004_v27  ;;  %v1947_v14 = vmul.f32 0.5, %v1912_v61  ;;  %v1916_v26 = vadd.f32 %v1915_v7, %v3342_v40 }
 0x402   : > { %2067 = vst [vmem:[%s3356_s28 + $0xa8] sm:$0xff] %v2035_v5  ;;  %v2037_v36 = vadd.f32 0.5, %v2005_v29  ;;  %2582 = vtanh.f32 %v1946_v30  ;;  %v1948_v23 = vmul.f32 0.5, %v1914_v33 }
 0x403   : > { %2068 = vst [vmem:[%s3356_s28 + $0xb0] sm:$0xff] %v2036_v21  ;;  %2584 = vtanh.f32 %v1947_v14  ;;  %v1949_v38 = vmul.f32 0.5, %v1916_v26 }
 0x404   : > { %v2575_v32 = vpop.eup %2574  ;;  %2069 = vst [vmem:[%s3356_s28 + $0xb8] sm:$0xff] %v2037_v36  ;;  %2586 = vtanh.f32 %v1948_v23 }
 0x405   : > { %v2577_v55 = vpop.eup %2576  ;;  %v2006_v37 = vmul.f32 0.5, %v2575_v32  ;;  %2588 = vtanh.f32 %v1949_v38 }
 0x406   : > { %v2579_v39 = vpop.eup %2578  ;;  %v2007_v41 = vmul.f32 0.5, %v2577_v55 }
 0x407   : > { %v2581_v40 = vpop.eup %2580  ;;  %v2038_v42 = vadd.f32 0.5, %v2006_v37  ;;  %v2008_v43 = vmul.f32 0.5, %v2579_v39 }
 0x408   : > { %v2039_v44 = vadd.f32 0.5, %v2007_v41  ;;  %v2009_v18 = vmul.f32 0.5, %v2581_v40 }
 0x409   : > { %2070 = vst [vmem:[%s3356_s28 + $0xc0] sm:$0xff] %v2038_v42  ;;  %v2040_v6 = vadd.f32 0.5, %v2008_v43 }
 0x40a   : > { %2071 = vst [vmem:[%s3356_s28 + $0xc8] sm:$0xff] %v2039_v44  ;;  %v2041_v28 = vadd.f32 0.5, %v2009_v18 }
 0x40b   : > { %2072 = vst [vmem:[%s3356_s28 + $0xd0] sm:$0xff] %v2040_v6 }
 0x40c   : > { %v2583_v47 = vpop.eup %2582  ;;  %2073 = vst [vmem:[%s3356_s28 + $0xd8] sm:$0xff] %v2041_v28 }
 0x40d   : > { %v2585_v35 = vpop.eup %2584  ;;  %v2010_v48 = vmul.f32 0.5, %v2583_v47 }
 0x40e   : > { %v2587_v49 = vpop.eup %2586  ;;  %v2011_v52 = vmul.f32 0.5, %v2585_v35 }
 0x40f   : > { %v2589_v63 = vpop.eup %2588  ;;  %v2042_v25 = vadd.f32 0.5, %v2010_v48  ;;  %v2012_v54 = vmul.f32 0.5, %v2587_v49 }
 0x410   : > { %v2043_v56 = vadd.f32 0.5, %v2011_v52  ;;  %v2013_v45 = vmul.f32 0.5, %v2589_v63 }
 0x411   : > { %2074 = vst [vmem:[%s3356_s28 + $0xe0] sm:$0xff] %v2042_v25  ;;  %v2044_v46 = vadd.f32 0.5, %v2012_v54 }
 0x412   : > { %2075 = vst [vmem:[%s3356_s28 + $0xe8] sm:$0xff] %v2043_v56  ;;  %v2045_v31 = vadd.f32 0.5, %v2013_v45 }
 0x413   : > { %2076 = vst [vmem:[%s3356_s28 + $0xf0] sm:$0xff] %v2044_v46 }
 0x414   : > { %2077 = vst [vmem:[%s3356_s28 + $0xf8] sm:$0xff] %v2045_v31 }
 0x415 PF: > { %s22_s17 = sadd.s32 1, %s2596_s17  }
 0x416   : > { %p19_p4 = scmp.ge.s32.totalorder %s22_s17, 6  }
 0x418   :  { %21 = sbr.rel (!%p19_p4) target bundleno = 1 (0x1), region = 105 }

</bundles_post_ra>
